<compile_context>
chip_gen: v7x
topology: tpu7x:2x2x1
jax: 0.10.0
libtpu: 0.0.40
codegen_flags: <defaults>
</compile_context>

<pallas_src>
import math

import jax
import jax.numpy as jnp
from jax.experimental import pallas as pl
from jax.experimental.pallas import tpu as pltpu

# ----- model dimensions (small synthetic config) -----
B = 2          # batch
S = 8          # sequence length
H = 32         # hidden size
NH = 2         # attention heads
DH = H // NH
FFN = 64       # intermediate size
VOCAB = 50
NTYPES = 2
NLAYERS = 2
LN_EPS = 1e-5
NEG_INF = -1e9
GP = 128       # lane-group width: Q/K/V column groups padded to 128 lanes each


# ---------------------------------------------------------------------------
# in-kernel helpers (pure jnp, traced inside the Pallas body)
# ---------------------------------------------------------------------------
def _layernorm(x, g, b):
    mu = jnp.mean(x, axis=-1, keepdims=True)
    var = jnp.mean((x - mu) ** 2, axis=-1, keepdims=True)
    return (x - mu) * jax.lax.rsqrt(var + LN_EPS) * g + b


def _gelu(x):
    # TODO(synk): RoBERTa uses exact erf-GELU; tanh approximation kept for the EUP path.
    c = math.sqrt(2.0 / math.pi)
    return 0.5 * x * (1.0 + jnp.tanh(c * (x + 0.044715 * x * x * x)))


# ---------------------------------------------------------------------------
# single fused kernel: embedding gather + LN -> NLAYERS encoder layers -> head
# no grid; all weights + activations are VMEM/vreg resident.
# ---------------------------------------------------------------------------
def fused_forward_kernel(x1_ref, tt_ref, amask_ref, num1_ref, num2_ref,
                         wt_emb_ref, pos_ref, emb_ln_ref, hm_ref,
                         wqkv_ref, bqkv_ref, wo_ref, bo_ref, ln_ref,
                         w1_ref, b1_ref, w2_ref, b2_ref,
                         wenc_ref, wnum_ref, clsb_ref,
                         o_ref):
    # ----- embedding gather: one one-hot matmul for word + token-type tables -----
    ids_w = x1_ref[...]                                   # (B*S, 1) int32
    ids_t = tt_ref[...] + VOCAB                           # (B*S, 1) -> offset into type rows
    iota = jax.lax.broadcasted_iota(jnp.int32, (B * S, VOCAB + NTYPES), 1)
    onehot = ((iota == ids_w).astype(jnp.float32)
              + (iota == ids_t).astype(jnp.float32))      # (B*S, V+T), two hots per row
    emb = (jnp.dot(onehot, wt_emb_ref[...], preferred_element_type=jnp.float32)
           + pos_ref[...])                                # (B*S, H)

    emb_ln = emb_ln_ref[...]                              # (2, H): [gamma, beta]
    h = _layernorm(emb, emb_ln[0:1, :], emb_ln[1:2, :])   # (B*S, H)

    # ----- additive attention bias from the mask, once for all layers/heads -----
    bias3 = (1.0 - amask_ref[...].astype(jnp.float32)) * NEG_INF      # (B, 1, S)
    bias_bh = jnp.concatenate([bias3] * NH, axis=0)                   # (NH*B, 1, S)
    hms = [hm_ref[hd] for hd in range(NH)]                            # NH x (1, GP) lane masks

    for l in range(NLAYERS):                              # static unroll over layers
        # --- fused QKV projection: one matmul; groups are 128-lane aligned ---
        # (1/sqrt(DH) scale is pre-folded into the Q columns of wqkv/bqkv)
        qkv = (jnp.dot(h, wqkv_ref[l], preferred_element_type=jnp.float32)
               + bqkv_ref[l])                             # (B*S, 3*GP)
        q3 = qkv[:, 0:GP].reshape(B, S, GP)               # tile-aligned slices, no lane shift
        k3 = qkv[:, GP:2 * GP].reshape(B, S, GP)
        v3 = qkv[:, 2 * GP:3 * GP].reshape(B, S, GP)

        # head separation via lane masks; heads folded into the einsum batch dim
        q_bh = jnp.concatenate([q3 * hms[hd] for hd in range(NH)], axis=0)   # (NH*B, S, GP)
        k_bh = jnp.concatenate([k3] * NH, axis=0)                            # (NH*B, S, GP)
        v_bh = jnp.concatenate([v3] * NH, axis=0)                            # (NH*B, S, GP)

        s = jnp.einsum('bqd,bkd->bqk', q_bh, k_bh,
                       preferred_element_type=jnp.float32) + bias_bh         # (NH*B, S, S)
        s = s - jnp.max(s, axis=-1, keepdims=True)
        p = jnp.exp(s)
        p = p * pl.reciprocal(jnp.sum(p, axis=-1, keepdims=True), approx=True)
        ctx = jnp.einsum('bqk,bkd->bqd', p, v_bh,
                         preferred_element_type=jnp.float32)                 # (NH*B, S, GP)

        # recombine heads back into concat-head lane layout (lanes >= H stay zero)
        ctx_c = ctx[0:B] * hms[0]
        for hd in range(1, NH):
            ctx_c = ctx_c + ctx[hd * B:(hd + 1) * B] * hms[hd]               # (B, S, GP)

        # --- single out-projection matmul, bias added once ---
        attn = (jnp.dot(ctx_c.reshape(B * S, GP), wo_ref[l],
                        preferred_element_type=jnp.float32) + bo_ref[l])     # (B*S, H)

        ln_l = ln_ref[l]                                  # (4, H): [g1, b1, g2, b2]
        h = _layernorm(h + attn, ln_l[0:1, :], ln_l[1:2, :])

        inter = _gelu(jnp.dot(h, w1_ref[l],
                              preferred_element_type=jnp.float32) + b1_ref[l])
        ff = jnp.dot(inter, w2_ref[l],
                     preferred_element_type=jnp.float32) + b2_ref[l]
        h = _layernorm(h + ff, ln_l[2:3, :], ln_l[3:4, :])

    # ----- [CLS] gather + Ditto head (calculate_difference + classifier) -----
    enc = h.reshape(B, S, H)[:, 0, :]                     # (B, H) strided sublane read

    n1 = num1_ref[...]                                    # (B, 1)
    n2 = num2_ref[...]
    diff = jnp.abs(n1 - n2) * 2.0 / (n1 + n2)
    fmax = jnp.float32(jnp.finfo(jnp.float32).max)
    diff = jnp.where(diff != diff, jnp.float32(0.0), diff)     # nan  -> 0
    diff = jnp.where(diff == jnp.inf, fmax, diff)               # +inf -> fmax
    diff = jnp.where(diff == -jnp.inf, -fmax, diff)             # -inf -> -fmax

    # logits = [enc | diff] @ W_cls.T + b  ==  enc @ W_enc + diff * W_num + b
    o_ref[...] = (jnp.dot(enc, wenc_ref[...], preferred_element_type=jnp.float32)
                  + diff * wnum_ref[...] + clsb_ref[...])


def fused_forward_pallas(x1_flat, tt_flat, amask, num1, num2, pp):
    vmem = pl.BlockSpec(memory_space=pltpu.MemorySpace.VMEM)
    operands = (x1_flat, tt_flat, amask, num1, num2,
                pp["wt_emb"], pp["pos"], pp["emb_ln"], pp["head_mask"],
                pp["wqkv"], pp["bqkv"], pp["wo"], pp["bo"], pp["ln"],
                pp["w1"], pp["b1"], pp["w2"], pp["b2"],
                pp["w_enc"], pp["w_num"], pp["cls_b"])
    return pl.pallas_call(
        fused_forward_kernel,
        out_shape=jax.ShapeDtypeStruct((B, 2), jnp.float32),
        in_specs=[vmem] * len(operands),
        out_specs=vmem,
    )(*operands)


# ---------------------------------------------------------------------------
# parameter init (deterministic, BERT-style N(0, 0.02)) -- PyTorch-like layout
# ---------------------------------------------------------------------------
def init_params(key):
    ks = iter(jax.random.split(key, 64))
    std = 0.02
    nrm = lambda shp: (std * jax.random.normal(next(ks), shp)).astype(jnp.float32)
    ones = lambda shp: jnp.ones(shp, jnp.float32)
    zeros = lambda shp: jnp.zeros(shp, jnp.float32)

    layers = []
    for _ in range(NLAYERS):
        layers.append(dict(
            wq=nrm((H, H)), bq=zeros((1, H)),
            wk=nrm((H, H)), bk=zeros((1, H)),
            wv=nrm((H, H)), bv=zeros((1, H)),
            wo=nrm((H, H)), bo=zeros((1, H)),
            g1=ones((1, H)), be1=zeros((1, H)),
            w1=nrm((H, FFN)), b1=zeros((1, FFN)),
            w2=nrm((FFN, H)), b2=zeros((1, H)),
            g2=ones((1, H)), be2=zeros((1, H)),
        ))

    W_cls = nrm((2, H + 1))                  # nn.Linear(1 + hidden, 2) weight
    return dict(
        word_emb=nrm((VOCAB, H)),
        pos_emb=nrm((S, H)),
        type_emb=nrm((NTYPES, H)),
        emb_ln_g=ones((1, H)),
        emb_ln_b=zeros((1, H)),
        layers=layers,
        w_enc=W_cls[:, :H].T,                # (H, 2)  — columns for enc
        w_num=W_cls[:, H:].T,                # (1, 2)  — column for numerical feature
        cls_b=zeros((1, 2)),
    )


# ---------------------------------------------------------------------------
# one-time parameter packing for the fused kernel:
#   * fuse Wq/Wk/Wv -> (H, 3*128) with each group padded to a 128-lane boundary
#     and the 1/sqrt(DH) attention scale folded into the Q columns
#   * pad Wo to (128, H); stack all per-layer tensors along a leading layer axis
#   * pack LN gamma/beta into one (NLAYERS, 4, H) array
#   * concat word+type embedding tables, pre-tile position embeddings to (B*S, H)
#   * precompute per-head lane masks (NH, 1, 128)
# ---------------------------------------------------------------------------
def pack_params(params):
    scale = 1.0 / math.sqrt(DH)
    padc = lambda w: jnp.pad(w, ((0, 0), (0, GP - w.shape[1])))   # pad columns to 128
    wqkv, bqkv, wo, bo, ln, w1, b1, w2, b2 = ([] for _ in range(9))
    for lp in params["layers"]:
        wqkv.append(jnp.concatenate(
            [padc(lp["wq"] * scale), padc(lp["wk"]), padc(lp["wv"])], axis=1))   # (H, 3*GP)
        bqkv.append(jnp.concatenate(
            [padc(lp["bq"] * scale), padc(lp["bk"]), padc(lp["bv"])], axis=1))   # (1, 3*GP)
        wo.append(jnp.pad(lp["wo"], ((0, GP - H), (0, 0))))                      # (GP, H)
        bo.append(lp["bo"])
        ln.append(jnp.concatenate([lp["g1"], lp["be1"], lp["g2"], lp["be2"]], axis=0))
        w1.append(lp["w1"]); b1.append(lp["b1"])
        w2.append(lp["w2"]); b2.append(lp["b2"])
    stack = lambda xs: jnp.stack(xs, axis=0)

    lane = jnp.arange(GP)
    head_mask = jnp.stack(
        [((lane >= hd * DH) & (lane < (hd + 1) * DH)).astype(jnp.float32)[None, :]
         for hd in range(NH)], axis=0)                                           # (NH, 1, GP)

    return dict(
        wt_emb=jnp.concatenate([params["word_emb"], params["type_emb"]], axis=0),  # (V+T, H)
        pos=jnp.tile(params["pos_emb"], (B, 1)),                                   # (B*S, H)
        emb_ln=jnp.concatenate([params["emb_ln_g"], params["emb_ln_b"]], axis=0),  # (2, H)
        head_mask=head_mask,
        wqkv=stack(wqkv), bqkv=stack(bqkv),            # (L, H, 3GP), (L, 1, 3GP)
        wo=stack(wo), bo=stack(bo),                    # (L, GP, H),  (L, 1, H)
        ln=stack(ln),                                  # (L, 4, H)
        w1=stack(w1), b1=stack(b1),                    # (L, H, FFN), (L, 1, FFN)
        w2=stack(w2), b2=stack(b2),                    # (L, FFN, H), (L, 1, H)
        w_enc=params["w_enc"], w_num=params["w_num"], cls_b=params["cls_b"],
    )


# ---------------------------------------------------------------------------
# forward (x2=None branch of DittoModel.forward) -- one fused Pallas call,
# wrapper only does free metadata reshapes of the integer inputs.
# ---------------------------------------------------------------------------
@jax.jit
def ditto_forward(pp, x1, attention_mask, token_type_ids, num1, num2):
    return fused_forward_pallas(
        x1.reshape(B * S, 1).astype(jnp.int32),
        token_type_ids.reshape(B * S, 1).astype(jnp.int32),
        attention_mask.reshape(B, 1, S).astype(jnp.int32),
        num1, num2, pp)                                              # (B, 2)


if __name__ == "__main__":
    key = jax.random.PRNGKey(0)
    pkey, dkey = jax.random.split(key)
    params = pack_params(init_params(pkey))

    k1, k2, k3 = jax.random.split(dkey, 3)
    x1 = jax.random.randint(k1, (B, S), 0, VOCAB, dtype=jnp.int32)
    attention_mask = jnp.ones((B, S), jnp.int32)
    token_type_ids = jnp.zeros((B, S), jnp.int32)
    num1 = jax.random.uniform(k2, (B, 1), jnp.float32)
    num2 = jax.random.uniform(k3, (B, 1), jnp.float32)

    out = ditto_forward(params, x1, attention_mask, token_type_ids, num1, num2)
    out = jax.block_until_ready(out)
    assert out.shape == (B, 2) and out.dtype == jnp.float32
    assert bool(jnp.all(jnp.isfinite(out)))
    print("KERNEL_OK")
</pallas_src>

<mosaic_0001>
module attributes {stable_mosaic.version = 11 : i64} {
  func.func @fused_forward_kernel(%arg0: memref<16x1xi32, #tpu.memory_space<vmem>>, %arg1: memref<16x1xi32, #tpu.memory_space<vmem>>, %arg2: memref<2x1x8xi32, #tpu.memory_space<vmem>>, %arg3: memref<2x1xf32, #tpu.memory_space<vmem>>, %arg4: memref<2x1xf32, #tpu.memory_space<vmem>>, %arg5: memref<52x32xf32, #tpu.memory_space<vmem>>, %arg6: memref<16x32xf32, #tpu.memory_space<vmem>>, %arg7: memref<2x32xf32, #tpu.memory_space<vmem>>, %arg8: memref<2x1x128xf32, #tpu.memory_space<vmem>>, %arg9: memref<2x32x384xf32, #tpu.memory_space<vmem>>, %arg10: memref<2x1x384xf32, #tpu.memory_space<vmem>>, %arg11: memref<2x128x32xf32, #tpu.memory_space<vmem>>, %arg12: memref<2x1x32xf32, #tpu.memory_space<vmem>>, %arg13: memref<2x4x32xf32, #tpu.memory_space<vmem>>, %arg14: memref<2x32x64xf32, #tpu.memory_space<vmem>>, %arg15: memref<2x1x64xf32, #tpu.memory_space<vmem>>, %arg16: memref<2x64x32xf32, #tpu.memory_space<vmem>>, %arg17: memref<2x1x32xf32, #tpu.memory_space<vmem>>, %arg18: memref<32x2xf32, #tpu.memory_space<vmem>>, %arg19: memref<1x2xf32, #tpu.memory_space<vmem>>, %arg20: memref<1x2xf32, #tpu.memory_space<vmem>>, %arg21: memref<2x2xf32, #tpu.memory_space<vmem>>) attributes {dimension_semantics = [], scalar_prefetch = 0 : i64, scratch_operands = 0 : i64, tpu.core_type = #tpu.core_type<tc>} {
    %c0 = arith.constant 0 : index
    %c0_0 = arith.constant 0 : index
    %0 = vector.load %arg0[%c0, %c0_0] : memref<16x1xi32, #tpu.memory_space<vmem>>, vector<16x1xi32>
    %c0_1 = arith.constant 0 : index
    %c0_2 = arith.constant 0 : index
    %1 = vector.load %arg1[%c0_1, %c0_2] : memref<16x1xi32, #tpu.memory_space<vmem>>, vector<16x1xi32>
    %c50_i32 = arith.constant 50 : i32
    %2 = vector.broadcast %c50_i32 : i32 to vector<16x1xi32>
    %3 = arith.addi %1, %2 : vector<16x1xi32>
    %4 = tpu.iota {dimensions = array<i32: 1>} : vector<16x52xi32>
    %5 = vector.broadcast %0 : vector<16x1xi32> to vector<16x52xi32>
    %6 = arith.cmpi eq, %4, %5 : vector<16x52xi32>
    %7 = arith.extui %6 : vector<16x52xi1> to vector<16x52xi32>
    %8 = arith.sitofp %7 : vector<16x52xi32> to vector<16x52xf32>
    %9 = vector.broadcast %3 : vector<16x1xi32> to vector<16x52xi32>
    %10 = arith.cmpi eq, %4, %9 : vector<16x52xi32>
    %11 = arith.extui %10 : vector<16x52xi1> to vector<16x52xi32>
    %12 = arith.sitofp %11 : vector<16x52xi32> to vector<16x52xf32>
    %13 = arith.addf %8, %12 : vector<16x52xf32>
    %c0_3 = arith.constant 0 : index
    %c0_4 = arith.constant 0 : index
    %14 = vector.load %arg5[%c0_3, %c0_4] : memref<52x32xf32, #tpu.memory_space<vmem>>, vector<52x32xf32>
    %cst = arith.constant dense<0.000000e+00> : vector<16x32xf32>
    %15 = tpu.matmul %13, %14, %cst {dimension_numbers = #tpu.dot_dimension_numbers<[1], [0], [0], [1], [0, 0, 1, 1], [], []>} : vector<16x52xf32>, vector<52x32xf32>, vector<16x32xf32> -> vector<16x32xf32>
    %c0_5 = arith.constant 0 : index
    %c0_6 = arith.constant 0 : index
    %16 = vector.load %arg6[%c0_5, %c0_6] : memref<16x32xf32, #tpu.memory_space<vmem>>, vector<16x32xf32>
    %17 = arith.addf %15, %16 : vector<16x32xf32>
    %c0_7 = arith.constant 0 : index
    %c0_8 = arith.constant 0 : index
    %18 = vector.load %arg7[%c0_7, %c0_8] : memref<2x32xf32, #tpu.memory_space<vmem>>, vector<2x32xf32>
    %19 = vector.extract_strided_slice %18 {offsets = [0, 0], sizes = [1, 32], strides = [1, 1]} : vector<2x32xf32> to vector<1x32xf32>
    %20 = vector.extract_strided_slice %18 {offsets = [1, 0], sizes = [1, 32], strides = [1, 1]} : vector<2x32xf32> to vector<1x32xf32>
    %cst_9 = arith.constant dense<0.000000e+00> : vector<16xf32>
    %21 = vector.multi_reduction <add>, %17, %cst_9 [1] : vector<16x32xf32> to vector<16xf32>
    %22 = vector.shape_cast %21 : vector<16xf32> to vector<16x1xf32>
    %cst_10 = arith.constant 3.200000e+01 : f32
    %23 = vector.broadcast %cst_10 : f32 to vector<16x1xf32>
    %24 = arith.divf %22, %23 : vector<16x1xf32>
    %25 = vector.broadcast %24 : vector<16x1xf32> to vector<16x32xf32>
    %26 = arith.subf %17, %25 : vector<16x32xf32>
    %27 = arith.mulf %26, %26 : vector<16x32xf32>
    %cst_11 = arith.constant dense<0.000000e+00> : vector<16xf32>
    %28 = vector.multi_reduction <add>, %27, %cst_11 [1] : vector<16x32xf32> to vector<16xf32>
    %29 = vector.shape_cast %28 : vector<16xf32> to vector<16x1xf32>
    %cst_12 = arith.constant 3.200000e+01 : f32
    %30 = vector.broadcast %cst_12 : f32 to vector<16x1xf32>
    %31 = arith.divf %29, %30 : vector<16x1xf32>
    %32 = vector.broadcast %24 : vector<16x1xf32> to vector<16x32xf32>
    %33 = arith.subf %17, %32 : vector<16x32xf32>
    %cst_13 = arith.constant 9.99999974E-6 : f32
    %34 = vector.broadcast %cst_13 : f32 to vector<16x1xf32>
    %35 = arith.addf %31, %34 : vector<16x1xf32>
    %36 = math.rsqrt %35 : vector<16x1xf32>
    %37 = vector.broadcast %36 : vector<16x1xf32> to vector<16x32xf32>
    %38 = arith.mulf %33, %37 : vector<16x32xf32>
    %39 = vector.broadcast %19 : vector<1x32xf32> to vector<16x32xf32>
    %40 = arith.mulf %38, %39 : vector<16x32xf32>
    %41 = vector.broadcast %20 : vector<1x32xf32> to vector<16x32xf32>
    %42 = arith.addf %40, %41 : vector<16x32xf32>
    %c0_14 = arith.constant 0 : index
    %c0_15 = arith.constant 0 : index
    %c0_16 = arith.constant 0 : index
    %43 = vector.load %arg2[%c0_14, %c0_15, %c0_16] : memref<2x1x8xi32, #tpu.memory_space<vmem>>, vector<2x1x8xi32>
    %44 = arith.sitofp %43 : vector<2x1x8xi32> to vector<2x1x8xf32>
    %cst_17 = arith.constant 1.000000e+00 : f32
    %45 = vector.broadcast %cst_17 : f32 to vector<2x1x8xf32>
    %46 = arith.subf %45, %44 : vector<2x1x8xf32>
    %cst_18 = arith.constant -1.000000e+09 : f32
    %47 = vector.broadcast %cst_18 : f32 to vector<2x1x8xf32>
    %48 = arith.mulf %46, %47 : vector<2x1x8xf32>
    %49 = tpu.concatenate %48, %48 in 0 : vector<2x1x8xf32>, vector<2x1x8xf32> -> vector<4x1x8xf32>
    %c0_19 = arith.constant 0 : index
    %c0_20 = arith.constant 0 : index
    %c0_21 = arith.constant 0 : index
    %50 = vector.load %arg8[%c0_19, %c0_20, %c0_21] : memref<2x1x128xf32, #tpu.memory_space<vmem>>, vector<1x1x128xf32>
    %51 = vector.shape_cast %50 : vector<1x1x128xf32> to vector<1x128xf32>
    %c1 = arith.constant 1 : index
    %c0_22 = arith.constant 0 : index
    %c0_23 = arith.constant 0 : index
    %52 = vector.load %arg8[%c1, %c0_22, %c0_23] : memref<2x1x128xf32, #tpu.memory_space<vmem>>, vector<1x1x128xf32>
    %53 = vector.shape_cast %52 : vector<1x1x128xf32> to vector<1x128xf32>
    %c0_24 = arith.constant 0 : index
    %c0_25 = arith.constant 0 : index
    %c0_26 = arith.constant 0 : index
    %54 = vector.load %arg9[%c0_24, %c0_25, %c0_26] : memref<2x32x384xf32, #tpu.memory_space<vmem>>, vector<1x32x384xf32>
    %55 = vector.shape_cast %54 : vector<1x32x384xf32> to vector<32x384xf32>
    %cst_27 = arith.constant dense<0.000000e+00> : vector<16x384xf32>
    %56 = tpu.matmul %42, %55, %cst_27 {dimension_numbers = #tpu.dot_dimension_numbers<[1], [0], [0], [1], [0, 0, 1, 1], [], []>} : vector<16x32xf32>, vector<32x384xf32>, vector<16x384xf32> -> vector<16x384xf32>
    %c0_28 = arith.constant 0 : index
    %c0_29 = arith.constant 0 : index
    %c0_30 = arith.constant 0 : index
    %57 = vector.load %arg10[%c0_28, %c0_29, %c0_30] : memref<2x1x384xf32, #tpu.memory_space<vmem>>, vector<1x1x384xf32>
    %58 = vector.shape_cast %57 : vector<1x1x384xf32> to vector<1x384xf32>
    %59 = vector.broadcast %58 : vector<1x384xf32> to vector<16x384xf32>
    %60 = arith.addf %56, %59 : vector<16x384xf32>
    %61 = vector.extract_strided_slice %60 {offsets = [0, 0], sizes = [16, 128], strides = [1, 1]} : vector<16x384xf32> to vector<16x128xf32>
    %62 = vector.shape_cast %61 : vector<16x128xf32> to vector<2x8x128xf32>
    %63 = vector.extract_strided_slice %60 {offsets = [0, 128], sizes = [16, 128], strides = [1, 1]} : vector<16x384xf32> to vector<16x128xf32>
    %64 = vector.shape_cast %63 : vector<16x128xf32> to vector<2x8x128xf32>
    %65 = vector.extract_strided_slice %60 {offsets = [0, 256], sizes = [16, 128], strides = [1, 1]} : vector<16x384xf32> to vector<16x128xf32>
    %66 = vector.shape_cast %65 : vector<16x128xf32> to vector<2x8x128xf32>
    %67 = vector.shape_cast %51 : vector<1x128xf32> to vector<1x1x128xf32>
    %68 = vector.broadcast %67 : vector<1x1x128xf32> to vector<2x8x128xf32>
    %69 = arith.mulf %62, %68 : vector<2x8x128xf32>
    %70 = vector.shape_cast %53 : vector<1x128xf32> to vector<1x1x128xf32>
    %71 = vector.broadcast %70 : vector<1x1x128xf32> to vector<2x8x128xf32>
    %72 = arith.mulf %62, %71 : vector<2x8x128xf32>
    %73 = tpu.concatenate %69, %72 in 0 : vector<2x8x128xf32>, vector<2x8x128xf32> -> vector<4x8x128xf32>
    %74 = tpu.concatenate %64, %64 in 0 : vector<2x8x128xf32>, vector<2x8x128xf32> -> vector<4x8x128xf32>
    %75 = tpu.concatenate %66, %66 in 0 : vector<2x8x128xf32>, vector<2x8x128xf32> -> vector<4x8x128xf32>
    "tpu.trace_start"() <{level = 10 : i32, message = "bqd,bkd->bqk"}> : () -> ()
    %cst_31 = arith.constant dense<0.000000e+00> : vector<4x8x8xf32>
    %76 = tpu.matmul %73, %74, %cst_31 {dimension_numbers = #tpu.dot_dimension_numbers<[2], [2], [1], [1], [0, 0, 0, 1, 1, 1], [0], [0]>} : vector<4x8x128xf32>, vector<4x8x128xf32>, vector<4x8x8xf32> -> vector<4x8x8xf32>
    "tpu.trace_stop"() : () -> ()
    %77 = vector.broadcast %49 : vector<4x1x8xf32> to vector<4x8x8xf32>
    %78 = arith.addf %76, %77 : vector<4x8x8xf32>
    %cst_32 = arith.constant dense<0xFF800000> : vector<4x8xf32>
    %79 = vector.multi_reduction <maximumf>, %78, %cst_32 [2] : vector<4x8x8xf32> to vector<4x8xf32>
    %80 = vector.shape_cast %79 : vector<4x8xf32> to vector<4x8x1xf32>
    %81 = vector.broadcast %80 : vector<4x8x1xf32> to vector<4x8x8xf32>
    %82 = arith.subf %78, %81 : vector<4x8x8xf32>
    %83 = math.exp %82 : vector<4x8x8xf32>
    %cst_33 = arith.constant dense<0.000000e+00> : vector<4x8xf32>
    %84 = vector.multi_reduction <add>, %83, %cst_33 [2] : vector<4x8x8xf32> to vector<4x8xf32>
    %85 = vector.shape_cast %84 : vector<4x8xf32> to vector<4x8x1xf32>
    %86 = tpu.reciprocal %85 {approx = true} : vector<4x8x1xf32> -> vector<4x8x1xf32>
    %87 = vector.broadcast %86 : vector<4x8x1xf32> to vector<4x8x8xf32>
    %88 = arith.mulf %83, %87 : vector<4x8x8xf32>
    "tpu.trace_start"() <{level = 10 : i32, message = "bqk,bkd->bqd"}> : () -> ()
    %cst_34 = arith.constant dense<0.000000e+00> : vector<4x8x128xf32>
    %89 = tpu.matmul %88, %75, %cst_34 {dimension_numbers = #tpu.dot_dimension_numbers<[2], [1], [1], [2], [0, 0, 0, 1, 1, 2], [0], [0]>} : vector<4x8x8xf32>, vector<4x8x128xf32>, vector<4x8x128xf32> -> vector<4x8x128xf32>
    "tpu.trace_stop"() : () -> ()
    %90 = vector.extract_strided_slice %89 {offsets = [0, 0, 0], sizes = [2, 8, 128], strides = [1, 1, 1]} : vector<4x8x128xf32> to vector<2x8x128xf32>
    %91 = vector.shape_cast %51 : vector<1x128xf32> to vector<1x1x128xf32>
    %92 = vector.broadcast %91 : vector<1x1x128xf32> to vector<2x8x128xf32>
    %93 = arith.mulf %90, %92 : vector<2x8x128xf32>
    %94 = vector.extract_strided_slice %89 {offsets = [2, 0, 0], sizes = [2, 8, 128], strides = [1, 1, 1]} : vector<4x8x128xf32> to vector<2x8x128xf32>
    %95 = vector.shape_cast %53 : vector<1x128xf32> to vector<1x1x128xf32>
    %96 = vector.broadcast %95 : vector<1x1x128xf32> to vector<2x8x128xf32>
    %97 = arith.mulf %94, %96 : vector<2x8x128xf32>
    %98 = arith.addf %93, %97 : vector<2x8x128xf32>
    %99 = vector.shape_cast %98 : vector<2x8x128xf32> to vector<16x128xf32>
    %c0_35 = arith.constant 0 : index
    %c0_36 = arith.constant 0 : index
    %c0_37 = arith.constant 0 : index
    %100 = vector.load %arg11[%c0_35, %c0_36, %c0_37] : memref<2x128x32xf32, #tpu.memory_space<vmem>>, vector<1x128x32xf32>
    %101 = vector.shape_cast %100 : vector<1x128x32xf32> to vector<128x32xf32>
    %cst_38 = arith.constant dense<0.000000e+00> : vector<16x32xf32>
    %102 = tpu.matmul %99, %101, %cst_38 {dimension_numbers = #tpu.dot_dimension_numbers<[1], [0], [0], [1], [0, 0, 1, 1], [], []>} : vector<16x128xf32>, vector<128x32xf32>, vector<16x32xf32> -> vector<16x32xf32>
    %c0_39 = arith.constant 0 : index
    %c0_40 = arith.constant 0 : index
    %c0_41 = arith.constant 0 : index
    %103 = vector.load %arg12[%c0_39, %c0_40, %c0_41] : memref<2x1x32xf32, #tpu.memory_space<vmem>>, vector<1x1x32xf32>
    %104 = vector.shape_cast %103 : vector<1x1x32xf32> to vector<1x32xf32>
    %105 = vector.broadcast %104 : vector<1x32xf32> to vector<16x32xf32>
    %106 = arith.addf %102, %105 : vector<16x32xf32>
    %c0_42 = arith.constant 0 : index
    %c0_43 = arith.constant 0 : index
    %c0_44 = arith.constant 0 : index
    %107 = vector.load %arg13[%c0_42, %c0_43, %c0_44] : memref<2x4x32xf32, #tpu.memory_space<vmem>>, vector<1x4x32xf32>
    %108 = vector.shape_cast %107 : vector<1x4x32xf32> to vector<4x32xf32>
    %109 = arith.addf %42, %106 : vector<16x32xf32>
    %110 = vector.extract_strided_slice %108 {offsets = [0, 0], sizes = [1, 32], strides = [1, 1]} : vector<4x32xf32> to vector<1x32xf32>
    %111 = vector.extract_strided_slice %108 {offsets = [1, 0], sizes = [1, 32], strides = [1, 1]} : vector<4x32xf32> to vector<1x32xf32>
    %cst_45 = arith.constant dense<0.000000e+00> : vector<16xf32>
    %112 = vector.multi_reduction <add>, %109, %cst_45 [1] : vector<16x32xf32> to vector<16xf32>
    %113 = vector.shape_cast %112 : vector<16xf32> to vector<16x1xf32>
    %cst_46 = arith.constant 3.200000e+01 : f32
    %114 = vector.broadcast %cst_46 : f32 to vector<16x1xf32>
    %115 = arith.divf %113, %114 : vector<16x1xf32>
    %116 = vector.broadcast %115 : vector<16x1xf32> to vector<16x32xf32>
    %117 = arith.subf %109, %116 : vector<16x32xf32>
    %118 = arith.mulf %117, %117 : vector<16x32xf32>
    %cst_47 = arith.constant dense<0.000000e+00> : vector<16xf32>
    %119 = vector.multi_reduction <add>, %118, %cst_47 [1] : vector<16x32xf32> to vector<16xf32>
    %120 = vector.shape_cast %119 : vector<16xf32> to vector<16x1xf32>
    %cst_48 = arith.constant 3.200000e+01 : f32
    %121 = vector.broadcast %cst_48 : f32 to vector<16x1xf32>
    %122 = arith.divf %120, %121 : vector<16x1xf32>
    %123 = vector.broadcast %115 : vector<16x1xf32> to vector<16x32xf32>
    %124 = arith.subf %109, %123 : vector<16x32xf32>
    %cst_49 = arith.constant 9.99999974E-6 : f32
    %125 = vector.broadcast %cst_49 : f32 to vector<16x1xf32>
    %126 = arith.addf %122, %125 : vector<16x1xf32>
    %127 = math.rsqrt %126 : vector<16x1xf32>
    %128 = vector.broadcast %127 : vector<16x1xf32> to vector<16x32xf32>
    %129 = arith.mulf %124, %128 : vector<16x32xf32>
    %130 = vector.broadcast %110 : vector<1x32xf32> to vector<16x32xf32>
    %131 = arith.mulf %129, %130 : vector<16x32xf32>
    %132 = vector.broadcast %111 : vector<1x32xf32> to vector<16x32xf32>
    %133 = arith.addf %131, %132 : vector<16x32xf32>
    %c0_50 = arith.constant 0 : index
    %c0_51 = arith.constant 0 : index
    %c0_52 = arith.constant 0 : index
    %134 = vector.load %arg14[%c0_50, %c0_51, %c0_52] : memref<2x32x64xf32, #tpu.memory_space<vmem>>, vector<1x32x64xf32>
    %135 = vector.shape_cast %134 : vector<1x32x64xf32> to vector<32x64xf32>
    %cst_53 = arith.constant dense<0.000000e+00> : vector<16x64xf32>
    %136 = tpu.matmul %133, %135, %cst_53 {dimension_numbers = #tpu.dot_dimension_numbers<[1], [0], [0], [1], [0, 0, 1, 1], [], []>} : vector<16x32xf32>, vector<32x64xf32>, vector<16x64xf32> -> vector<16x64xf32>
    %c0_54 = arith.constant 0 : index
    %c0_55 = arith.constant 0 : index
    %c0_56 = arith.constant 0 : index
    %137 = vector.load %arg15[%c0_54, %c0_55, %c0_56] : memref<2x1x64xf32, #tpu.memory_space<vmem>>, vector<1x1x64xf32>
    %138 = vector.shape_cast %137 : vector<1x1x64xf32> to vector<1x64xf32>
    %139 = vector.broadcast %138 : vector<1x64xf32> to vector<16x64xf32>
    %140 = arith.addf %136, %139 : vector<16x64xf32>
    %cst_57 = arith.constant 5.000000e-01 : f32
    %141 = vector.broadcast %cst_57 : f32 to vector<16x64xf32>
    %142 = arith.mulf %141, %140 : vector<16x64xf32>
    %cst_58 = arith.constant 4.471500e-02 : f32
    %143 = vector.broadcast %cst_58 : f32 to vector<16x64xf32>
    %144 = arith.mulf %143, %140 : vector<16x64xf32>
    %145 = arith.mulf %144, %140 : vector<16x64xf32>
    %146 = arith.mulf %145, %140 : vector<16x64xf32>
    %147 = arith.addf %140, %146 : vector<16x64xf32>
    %cst_59 = arith.constant 0.797884583 : f32
    %148 = vector.broadcast %cst_59 : f32 to vector<16x64xf32>
    %149 = arith.mulf %148, %147 : vector<16x64xf32>
    %150 = math.tanh %149 : vector<16x64xf32>
    %cst_60 = arith.constant 1.000000e+00 : f32
    %151 = vector.broadcast %cst_60 : f32 to vector<16x64xf32>
    %152 = arith.addf %151, %150 : vector<16x64xf32>
    %153 = arith.mulf %142, %152 : vector<16x64xf32>
    %c0_61 = arith.constant 0 : index
    %c0_62 = arith.constant 0 : index
    %c0_63 = arith.constant 0 : index
    %154 = vector.load %arg16[%c0_61, %c0_62, %c0_63] : memref<2x64x32xf32, #tpu.memory_space<vmem>>, vector<1x64x32xf32>
    %155 = vector.shape_cast %154 : vector<1x64x32xf32> to vector<64x32xf32>
    %cst_64 = arith.constant dense<0.000000e+00> : vector<16x32xf32>
    %156 = tpu.matmul %153, %155, %cst_64 {dimension_numbers = #tpu.dot_dimension_numbers<[1], [0], [0], [1], [0, 0, 1, 1], [], []>} : vector<16x64xf32>, vector<64x32xf32>, vector<16x32xf32> -> vector<16x32xf32>
    %c0_65 = arith.constant 0 : index
    %c0_66 = arith.constant 0 : index
    %c0_67 = arith.constant 0 : index
    %157 = vector.load %arg17[%c0_65, %c0_66, %c0_67] : memref<2x1x32xf32, #tpu.memory_space<vmem>>, vector<1x1x32xf32>
    %158 = vector.shape_cast %157 : vector<1x1x32xf32> to vector<1x32xf32>
    %159 = vector.broadcast %158 : vector<1x32xf32> to vector<16x32xf32>
    %160 = arith.addf %156, %159 : vector<16x32xf32>
    %161 = arith.addf %133, %160 : vector<16x32xf32>
    %162 = vector.extract_strided_slice %108 {offsets = [2, 0], sizes = [1, 32], strides = [1, 1]} : vector<4x32xf32> to vector<1x32xf32>
    %163 = vector.extract_strided_slice %108 {offsets = [3, 0], sizes = [1, 32], strides = [1, 1]} : vector<4x32xf32> to vector<1x32xf32>
    %cst_68 = arith.constant dense<0.000000e+00> : vector<16xf32>
    %164 = vector.multi_reduction <add>, %161, %cst_68 [1] : vector<16x32xf32> to vector<16xf32>
    %165 = vector.shape_cast %164 : vector<16xf32> to vector<16x1xf32>
    %cst_69 = arith.constant 3.200000e+01 : f32
    %166 = vector.broadcast %cst_69 : f32 to vector<16x1xf32>
    %167 = arith.divf %165, %166 : vector<16x1xf32>
    %168 = vector.broadcast %167 : vector<16x1xf32> to vector<16x32xf32>
    %169 = arith.subf %161, %168 : vector<16x32xf32>
    %170 = arith.mulf %169, %169 : vector<16x32xf32>
    %cst_70 = arith.constant dense<0.000000e+00> : vector<16xf32>
    %171 = vector.multi_reduction <add>, %170, %cst_70 [1] : vector<16x32xf32> to vector<16xf32>
    %172 = vector.shape_cast %171 : vector<16xf32> to vector<16x1xf32>
    %cst_71 = arith.constant 3.200000e+01 : f32
    %173 = vector.broadcast %cst_71 : f32 to vector<16x1xf32>
    %174 = arith.divf %172, %173 : vector<16x1xf32>
    %175 = vector.broadcast %167 : vector<16x1xf32> to vector<16x32xf32>
    %176 = arith.subf %161, %175 : vector<16x32xf32>
    %cst_72 = arith.constant 9.99999974E-6 : f32
    %177 = vector.broadcast %cst_72 : f32 to vector<16x1xf32>
    %178 = arith.addf %174, %177 : vector<16x1xf32>
    %179 = math.rsqrt %178 : vector<16x1xf32>
    %180 = vector.broadcast %179 : vector<16x1xf32> to vector<16x32xf32>
    %181 = arith.mulf %176, %180 : vector<16x32xf32>
    %182 = vector.broadcast %162 : vector<1x32xf32> to vector<16x32xf32>
    %183 = arith.mulf %181, %182 : vector<16x32xf32>
    %184 = vector.broadcast %163 : vector<1x32xf32> to vector<16x32xf32>
    %185 = arith.addf %183, %184 : vector<16x32xf32>
    %c1_73 = arith.constant 1 : index
    %c0_74 = arith.constant 0 : index
    %c0_75 = arith.constant 0 : index
    %186 = vector.load %arg9[%c1_73, %c0_74, %c0_75] : memref<2x32x384xf32, #tpu.memory_space<vmem>>, vector<1x32x384xf32>
    %187 = vector.shape_cast %186 : vector<1x32x384xf32> to vector<32x384xf32>
    %cst_76 = arith.constant dense<0.000000e+00> : vector<16x384xf32>
    %188 = tpu.matmul %185, %187, %cst_76 {dimension_numbers = #tpu.dot_dimension_numbers<[1], [0], [0], [1], [0, 0, 1, 1], [], []>} : vector<16x32xf32>, vector<32x384xf32>, vector<16x384xf32> -> vector<16x384xf32>
    %c1_77 = arith.constant 1 : index
    %c0_78 = arith.constant 0 : index
    %c0_79 = arith.constant 0 : index
    %189 = vector.load %arg10[%c1_77, %c0_78, %c0_79] : memref<2x1x384xf32, #tpu.memory_space<vmem>>, vector<1x1x384xf32>
    %190 = vector.shape_cast %189 : vector<1x1x384xf32> to vector<1x384xf32>
    %191 = vector.broadcast %190 : vector<1x384xf32> to vector<16x384xf32>
    %192 = arith.addf %188, %191 : vector<16x384xf32>
    %193 = vector.extract_strided_slice %192 {offsets = [0, 0], sizes = [16, 128], strides = [1, 1]} : vector<16x384xf32> to vector<16x128xf32>
    %194 = vector.shape_cast %193 : vector<16x128xf32> to vector<2x8x128xf32>
    %195 = vector.extract_strided_slice %192 {offsets = [0, 128], sizes = [16, 128], strides = [1, 1]} : vector<16x384xf32> to vector<16x128xf32>
    %196 = vector.shape_cast %195 : vector<16x128xf32> to vector<2x8x128xf32>
    %197 = vector.extract_strided_slice %192 {offsets = [0, 256], sizes = [16, 128], strides = [1, 1]} : vector<16x384xf32> to vector<16x128xf32>
    %198 = vector.shape_cast %197 : vector<16x128xf32> to vector<2x8x128xf32>
    %199 = vector.shape_cast %51 : vector<1x128xf32> to vector<1x1x128xf32>
    %200 = vector.broadcast %199 : vector<1x1x128xf32> to vector<2x8x128xf32>
    %201 = arith.mulf %194, %200 : vector<2x8x128xf32>
    %202 = vector.shape_cast %53 : vector<1x128xf32> to vector<1x1x128xf32>
    %203 = vector.broadcast %202 : vector<1x1x128xf32> to vector<2x8x128xf32>
    %204 = arith.mulf %194, %203 : vector<2x8x128xf32>
    %205 = tpu.concatenate %201, %204 in 0 : vector<2x8x128xf32>, vector<2x8x128xf32> -> vector<4x8x128xf32>
    %206 = tpu.concatenate %196, %196 in 0 : vector<2x8x128xf32>, vector<2x8x128xf32> -> vector<4x8x128xf32>
    %207 = tpu.concatenate %198, %198 in 0 : vector<2x8x128xf32>, vector<2x8x128xf32> -> vector<4x8x128xf32>
    "tpu.trace_start"() <{level = 10 : i32, message = "bqd,bkd->bqk"}> : () -> ()
    %cst_80 = arith.constant dense<0.000000e+00> : vector<4x8x8xf32>
    %208 = tpu.matmul %205, %206, %cst_80 {dimension_numbers = #tpu.dot_dimension_numbers<[2], [2], [1], [1], [0, 0, 0, 1, 1, 1], [0], [0]>} : vector<4x8x128xf32>, vector<4x8x128xf32>, vector<4x8x8xf32> -> vector<4x8x8xf32>
    "tpu.trace_stop"() : () -> ()
    %209 = vector.broadcast %49 : vector<4x1x8xf32> to vector<4x8x8xf32>
    %210 = arith.addf %208, %209 : vector<4x8x8xf32>
    %cst_81 = arith.constant dense<0xFF800000> : vector<4x8xf32>
    %211 = vector.multi_reduction <maximumf>, %210, %cst_81 [2] : vector<4x8x8xf32> to vector<4x8xf32>
    %212 = vector.shape_cast %211 : vector<4x8xf32> to vector<4x8x1xf32>
    %213 = vector.broadcast %212 : vector<4x8x1xf32> to vector<4x8x8xf32>
    %214 = arith.subf %210, %213 : vector<4x8x8xf32>
    %215 = math.exp %214 : vector<4x8x8xf32>
    %cst_82 = arith.constant dense<0.000000e+00> : vector<4x8xf32>
    %216 = vector.multi_reduction <add>, %215, %cst_82 [2] : vector<4x8x8xf32> to vector<4x8xf32>
    %217 = vector.shape_cast %216 : vector<4x8xf32> to vector<4x8x1xf32>
    %218 = tpu.reciprocal %217 {approx = true} : vector<4x8x1xf32> -> vector<4x8x1xf32>
    %219 = vector.broadcast %218 : vector<4x8x1xf32> to vector<4x8x8xf32>
    %220 = arith.mulf %215, %219 : vector<4x8x8xf32>
    "tpu.trace_start"() <{level = 10 : i32, message = "bqk,bkd->bqd"}> : () -> ()
    %cst_83 = arith.constant dense<0.000000e+00> : vector<4x8x128xf32>
    %221 = tpu.matmul %220, %207, %cst_83 {dimension_numbers = #tpu.dot_dimension_numbers<[2], [1], [1], [2], [0, 0, 0, 1, 1, 2], [0], [0]>} : vector<4x8x8xf32>, vector<4x8x128xf32>, vector<4x8x128xf32> -> vector<4x8x128xf32>
    "tpu.trace_stop"() : () -> ()
    %222 = vector.extract_strided_slice %221 {offsets = [0, 0, 0], sizes = [2, 8, 128], strides = [1, 1, 1]} : vector<4x8x128xf32> to vector<2x8x128xf32>
    %223 = vector.shape_cast %51 : vector<1x128xf32> to vector<1x1x128xf32>
    %224 = vector.broadcast %223 : vector<1x1x128xf32> to vector<2x8x128xf32>
    %225 = arith.mulf %222, %224 : vector<2x8x128xf32>
    %226 = vector.extract_strided_slice %221 {offsets = [2, 0, 0], sizes = [2, 8, 128], strides = [1, 1, 1]} : vector<4x8x128xf32> to vector<2x8x128xf32>
    %227 = vector.shape_cast %53 : vector<1x128xf32> to vector<1x1x128xf32>
    %228 = vector.broadcast %227 : vector<1x1x128xf32> to vector<2x8x128xf32>
    %229 = arith.mulf %226, %228 : vector<2x8x128xf32>
    %230 = arith.addf %225, %229 : vector<2x8x128xf32>
    %231 = vector.shape_cast %230 : vector<2x8x128xf32> to vector<16x128xf32>
    %c1_84 = arith.constant 1 : index
    %c0_85 = arith.constant 0 : index
    %c0_86 = arith.constant 0 : index
    %232 = vector.load %arg11[%c1_84, %c0_85, %c0_86] : memref<2x128x32xf32, #tpu.memory_space<vmem>>, vector<1x128x32xf32>
    %233 = vector.shape_cast %232 : vector<1x128x32xf32> to vector<128x32xf32>
    %cst_87 = arith.constant dense<0.000000e+00> : vector<16x32xf32>
    %234 = tpu.matmul %231, %233, %cst_87 {dimension_numbers = #tpu.dot_dimension_numbers<[1], [0], [0], [1], [0, 0, 1, 1], [], []>} : vector<16x128xf32>, vector<128x32xf32>, vector<16x32xf32> -> vector<16x32xf32>
    %c1_88 = arith.constant 1 : index
    %c0_89 = arith.constant 0 : index
    %c0_90 = arith.constant 0 : index
    %235 = vector.load %arg12[%c1_88, %c0_89, %c0_90] : memref<2x1x32xf32, #tpu.memory_space<vmem>>, vector<1x1x32xf32>
    %236 = vector.shape_cast %235 : vector<1x1x32xf32> to vector<1x32xf32>
    %237 = vector.broadcast %236 : vector<1x32xf32> to vector<16x32xf32>
    %238 = arith.addf %234, %237 : vector<16x32xf32>
    %c1_91 = arith.constant 1 : index
    %c0_92 = arith.constant 0 : index
    %c0_93 = arith.constant 0 : index
    %239 = vector.load %arg13[%c1_91, %c0_92, %c0_93] : memref<2x4x32xf32, #tpu.memory_space<vmem>>, vector<1x4x32xf32>
    %240 = vector.shape_cast %239 : vector<1x4x32xf32> to vector<4x32xf32>
    %241 = arith.addf %185, %238 : vector<16x32xf32>
    %242 = vector.extract_strided_slice %240 {offsets = [0, 0], sizes = [1, 32], strides = [1, 1]} : vector<4x32xf32> to vector<1x32xf32>
    %243 = vector.extract_strided_slice %240 {offsets = [1, 0], sizes = [1, 32], strides = [1, 1]} : vector<4x32xf32> to vector<1x32xf32>
    %cst_94 = arith.constant dense<0.000000e+00> : vector<16xf32>
    %244 = vector.multi_reduction <add>, %241, %cst_94 [1] : vector<16x32xf32> to vector<16xf32>
    %245 = vector.shape_cast %244 : vector<16xf32> to vector<16x1xf32>
    %cst_95 = arith.constant 3.200000e+01 : f32
    %246 = vector.broadcast %cst_95 : f32 to vector<16x1xf32>
    %247 = arith.divf %245, %246 : vector<16x1xf32>
    %248 = vector.broadcast %247 : vector<16x1xf32> to vector<16x32xf32>
    %249 = arith.subf %241, %248 : vector<16x32xf32>
    %250 = arith.mulf %249, %249 : vector<16x32xf32>
    %cst_96 = arith.constant dense<0.000000e+00> : vector<16xf32>
    %251 = vector.multi_reduction <add>, %250, %cst_96 [1] : vector<16x32xf32> to vector<16xf32>
    %252 = vector.shape_cast %251 : vector<16xf32> to vector<16x1xf32>
    %cst_97 = arith.constant 3.200000e+01 : f32
    %253 = vector.broadcast %cst_97 : f32 to vector<16x1xf32>
    %254 = arith.divf %252, %253 : vector<16x1xf32>
    %255 = vector.broadcast %247 : vector<16x1xf32> to vector<16x32xf32>
    %256 = arith.subf %241, %255 : vector<16x32xf32>
    %cst_98 = arith.constant 9.99999974E-6 : f32
    %257 = vector.broadcast %cst_98 : f32 to vector<16x1xf32>
    %258 = arith.addf %254, %257 : vector<16x1xf32>
    %259 = math.rsqrt %258 : vector<16x1xf32>
    %260 = vector.broadcast %259 : vector<16x1xf32> to vector<16x32xf32>
    %261 = arith.mulf %256, %260 : vector<16x32xf32>
    %262 = vector.broadcast %242 : vector<1x32xf32> to vector<16x32xf32>
    %263 = arith.mulf %261, %262 : vector<16x32xf32>
    %264 = vector.broadcast %243 : vector<1x32xf32> to vector<16x32xf32>
    %265 = arith.addf %263, %264 : vector<16x32xf32>
    %c1_99 = arith.constant 1 : index
    %c0_100 = arith.constant 0 : index
    %c0_101 = arith.constant 0 : index
    %266 = vector.load %arg14[%c1_99, %c0_100, %c0_101] : memref<2x32x64xf32, #tpu.memory_space<vmem>>, vector<1x32x64xf32>
    %267 = vector.shape_cast %266 : vector<1x32x64xf32> to vector<32x64xf32>
    %cst_102 = arith.constant dense<0.000000e+00> : vector<16x64xf32>
    %268 = tpu.matmul %265, %267, %cst_102 {dimension_numbers = #tpu.dot_dimension_numbers<[1], [0], [0], [1], [0, 0, 1, 1], [], []>} : vector<16x32xf32>, vector<32x64xf32>, vector<16x64xf32> -> vector<16x64xf32>
    %c1_103 = arith.constant 1 : index
    %c0_104 = arith.constant 0 : index
    %c0_105 = arith.constant 0 : index
    %269 = vector.load %arg15[%c1_103, %c0_104, %c0_105] : memref<2x1x64xf32, #tpu.memory_space<vmem>>, vector<1x1x64xf32>
    %270 = vector.shape_cast %269 : vector<1x1x64xf32> to vector<1x64xf32>
    %271 = vector.broadcast %270 : vector<1x64xf32> to vector<16x64xf32>
    %272 = arith.addf %268, %271 : vector<16x64xf32>
    %cst_106 = arith.constant 5.000000e-01 : f32
    %273 = vector.broadcast %cst_106 : f32 to vector<16x64xf32>
    %274 = arith.mulf %273, %272 : vector<16x64xf32>
    %cst_107 = arith.constant 4.471500e-02 : f32
    %275 = vector.broadcast %cst_107 : f32 to vector<16x64xf32>
    %276 = arith.mulf %275, %272 : vector<16x64xf32>
    %277 = arith.mulf %276, %272 : vector<16x64xf32>
    %278 = arith.mulf %277, %272 : vector<16x64xf32>
    %279 = arith.addf %272, %278 : vector<16x64xf32>
    %cst_108 = arith.constant 0.797884583 : f32
    %280 = vector.broadcast %cst_108 : f32 to vector<16x64xf32>
    %281 = arith.mulf %280, %279 : vector<16x64xf32>
    %282 = math.tanh %281 : vector<16x64xf32>
    %cst_109 = arith.constant 1.000000e+00 : f32
    %283 = vector.broadcast %cst_109 : f32 to vector<16x64xf32>
    %284 = arith.addf %283, %282 : vector<16x64xf32>
    %285 = arith.mulf %274, %284 : vector<16x64xf32>
    %c1_110 = arith.constant 1 : index
    %c0_111 = arith.constant 0 : index
    %c0_112 = arith.constant 0 : index
    %286 = vector.load %arg16[%c1_110, %c0_111, %c0_112] : memref<2x64x32xf32, #tpu.memory_space<vmem>>, vector<1x64x32xf32>
    %287 = vector.shape_cast %286 : vector<1x64x32xf32> to vector<64x32xf32>
    %cst_113 = arith.constant dense<0.000000e+00> : vector<16x32xf32>
    %288 = tpu.matmul %285, %287, %cst_113 {dimension_numbers = #tpu.dot_dimension_numbers<[1], [0], [0], [1], [0, 0, 1, 1], [], []>} : vector<16x64xf32>, vector<64x32xf32>, vector<16x32xf32> -> vector<16x32xf32>
    %c1_114 = arith.constant 1 : index
    %c0_115 = arith.constant 0 : index
    %c0_116 = arith.constant 0 : index
    %289 = vector.load %arg17[%c1_114, %c0_115, %c0_116] : memref<2x1x32xf32, #tpu.memory_space<vmem>>, vector<1x1x32xf32>
    %290 = vector.shape_cast %289 : vector<1x1x32xf32> to vector<1x32xf32>
    %291 = vector.broadcast %290 : vector<1x32xf32> to vector<16x32xf32>
    %292 = arith.addf %288, %291 : vector<16x32xf32>
    %293 = arith.addf %265, %292 : vector<16x32xf32>
    %294 = vector.extract_strided_slice %240 {offsets = [2, 0], sizes = [1, 32], strides = [1, 1]} : vector<4x32xf32> to vector<1x32xf32>
    %295 = vector.extract_strided_slice %240 {offsets = [3, 0], sizes = [1, 32], strides = [1, 1]} : vector<4x32xf32> to vector<1x32xf32>
    %cst_117 = arith.constant dense<0.000000e+00> : vector<16xf32>
    %296 = vector.multi_reduction <add>, %293, %cst_117 [1] : vector<16x32xf32> to vector<16xf32>
    %297 = vector.shape_cast %296 : vector<16xf32> to vector<16x1xf32>
    %cst_118 = arith.constant 3.200000e+01 : f32
    %298 = vector.broadcast %cst_118 : f32 to vector<16x1xf32>
    %299 = arith.divf %297, %298 : vector<16x1xf32>
    %300 = vector.broadcast %299 : vector<16x1xf32> to vector<16x32xf32>
    %301 = arith.subf %293, %300 : vector<16x32xf32>
    %302 = arith.mulf %301, %301 : vector<16x32xf32>
    %cst_119 = arith.constant dense<0.000000e+00> : vector<16xf32>
    %303 = vector.multi_reduction <add>, %302, %cst_119 [1] : vector<16x32xf32> to vector<16xf32>
    %304 = vector.shape_cast %303 : vector<16xf32> to vector<16x1xf32>
    %cst_120 = arith.constant 3.200000e+01 : f32
    %305 = vector.broadcast %cst_120 : f32 to vector<16x1xf32>
    %306 = arith.divf %304, %305 : vector<16x1xf32>
    %307 = vector.broadcast %299 : vector<16x1xf32> to vector<16x32xf32>
    %308 = arith.subf %293, %307 : vector<16x32xf32>
    %cst_121 = arith.constant 9.99999974E-6 : f32
    %309 = vector.broadcast %cst_121 : f32 to vector<16x1xf32>
    %310 = arith.addf %306, %309 : vector<16x1xf32>
    %311 = math.rsqrt %310 : vector<16x1xf32>
    %312 = vector.broadcast %311 : vector<16x1xf32> to vector<16x32xf32>
    %313 = arith.mulf %308, %312 : vector<16x32xf32>
    %314 = vector.broadcast %294 : vector<1x32xf32> to vector<16x32xf32>
    %315 = arith.mulf %313, %314 : vector<16x32xf32>
    %316 = vector.broadcast %295 : vector<1x32xf32> to vector<16x32xf32>
    %317 = arith.addf %315, %316 : vector<16x32xf32>
    %318 = vector.shape_cast %317 : vector<16x32xf32> to vector<2x8x32xf32>
    %319 = vector.extract_strided_slice %318 {offsets = [0, 0, 0], sizes = [2, 1, 32], strides = [1, 1, 1]} : vector<2x8x32xf32> to vector<2x1x32xf32>
    %320 = vector.shape_cast %319 : vector<2x1x32xf32> to vector<2x32xf32>
    %c0_122 = arith.constant 0 : index
    %c0_123 = arith.constant 0 : index
    %321 = vector.load %arg3[%c0_122, %c0_123] : memref<2x1xf32, #tpu.memory_space<vmem>>, vector<2x1xf32>
    %c0_124 = arith.constant 0 : index
    %c0_125 = arith.constant 0 : index
    %322 = vector.load %arg4[%c0_124, %c0_125] : memref<2x1xf32, #tpu.memory_space<vmem>>, vector<2x1xf32>
    %323 = arith.subf %321, %322 : vector<2x1xf32>
    %324 = math.absf %323 : vector<2x1xf32>
    %cst_126 = arith.constant 2.000000e+00 : f32
    %325 = vector.broadcast %cst_126 : f32 to vector<2x1xf32>
    %326 = arith.mulf %324, %325 : vector<2x1xf32>
    %327 = arith.addf %321, %322 : vector<2x1xf32>
    %328 = arith.divf %326, %327 : vector<2x1xf32>
    %329 = arith.cmpf one, %328, %328 : vector<2x1xf32>
    %cst_127 = arith.constant 0.000000e+00 : f32
    %330 = vector.broadcast %cst_127 : f32 to vector<2x1xf32>
    %331 = arith.select %329, %330, %328 : vector<2x1xi1>, vector<2x1xf32>
    %cst_128 = arith.constant 0x7F800000 : f32
    %332 = vector.broadcast %cst_128 : f32 to vector<2x1xf32>
    %333 = arith.cmpf oeq, %331, %332 : vector<2x1xf32>
    %cst_129 = arith.constant 3.40282347E+38 : f32
    %334 = vector.broadcast %cst_129 : f32 to vector<2x1xf32>
    %335 = arith.select %333, %334, %331 : vector<2x1xi1>, vector<2x1xf32>
    %cst_130 = arith.constant 0xFF800000 : f32
    %336 = vector.broadcast %cst_130 : f32 to vector<2x1xf32>
    %337 = arith.cmpf oeq, %335, %336 : vector<2x1xf32>
    %cst_131 = arith.constant 0.000000e+00 : f32
    %cst_132 = arith.constant 3.40282347E+38 : f32
    %338 = arith.subf %cst_131, %cst_132 : f32
    %339 = vector.broadcast %338 : f32 to vector<2x1xf32>
    %340 = arith.select %337, %339, %335 : vector<2x1xi1>, vector<2x1xf32>
    %c0_133 = arith.constant 0 : index
    %c0_134 = arith.constant 0 : index
    %341 = vector.load %arg18[%c0_133, %c0_134] : memref<32x2xf32, #tpu.memory_space<vmem>>, vector<32x2xf32>
    %cst_135 = arith.constant dense<0.000000e+00> : vector<2x2xf32>
    %342 = tpu.matmul %320, %341, %cst_135 {dimension_numbers = #tpu.dot_dimension_numbers<[1], [0], [0], [1], [0, 0, 1, 1], [], []>} : vector<2x32xf32>, vector<32x2xf32>, vector<2x2xf32> -> vector<2x2xf32>
    %c0_136 = arith.constant 0 : index
    %c0_137 = arith.constant 0 : index
    %343 = vector.load %arg19[%c0_136, %c0_137] : memref<1x2xf32, #tpu.memory_space<vmem>>, vector<1x2xf32>
    %344 = vector.broadcast %340 : vector<2x1xf32> to vector<2x2xf32>
    %345 = vector.broadcast %343 : vector<1x2xf32> to vector<2x2xf32>
    %346 = arith.mulf %344, %345 : vector<2x2xf32>
    %347 = arith.addf %342, %346 : vector<2x2xf32>
    %c0_138 = arith.constant 0 : index
    %c0_139 = arith.constant 0 : index
    %348 = vector.load %arg20[%c0_138, %c0_139] : memref<1x2xf32, #tpu.memory_space<vmem>>, vector<1x2xf32>
    %349 = vector.broadcast %348 : vector<1x2xf32> to vector<2x2xf32>
    %350 = arith.addf %347, %349 : vector<2x2xf32>
    %c0_140 = arith.constant 0 : index
    %c0_141 = arith.constant 0 : index
    %351 = vector.load %arg21[%c0_140, %c0_141] : memref<2x2xf32, #tpu.memory_space<vmem>>, vector<2x2xf32>
    tpu.vector_store %arg21[%c0_140, %c0_141], %350 {strides = array<i32>} : memref<2x2xf32, #tpu.memory_space<vmem>>, vector<2x2xf32>,
    return
  }
}

</mosaic_0001>

<bundles_post_ra>
// kernel: ditto_forward.1
= control target key start
LH: loop header
LB: loop body
LE: loop exit
PB: predicated region body
PF: predicated region fallthrough
CT: control target
= control target key end

     0   :  { %s4252_s0 = inlined_call_operand.vmem [shape: s32[16,1], index: 0, kind: input, shape index: {}]   ;;  %s4253_s1 = inlined_call_operand.vmem [shape: s32[16,1], index: 1, kind: input, shape index: {}]   ;;  %s4254_s2 = inlined_call_operand.vmem [shape: s32[2,1,8], index: 2, kind: input, shape index: {}]   ;;  %s4255_s3 = inlined_call_operand.vmem [shape: f32[2,1], index: 3, kind: input, shape index: {}]   ;;  %s4256_s4 = inlined_call_operand.vmem [shape: f32[2,1], index: 4, kind: input, shape index: {}]   ;;  %s4257_s5 = inlined_call_operand.vmem [shape: f32[52,32], index: 5, kind: input, shape index: {}]   ;;  %s4258_s6 = inlined_call_operand.vmem [shape: f32[16,32], index: 6, kind: input, shape index: {}]   ;;  %s4259_s7 = inlined_call_operand.vmem [shape: f32[2,32], index: 7, kind: input, shape index: {}]   ;;  %s4260_s8 = inlined_call_operand.vmem [shape: f32[2,1,128], index: 8, kind: input, shape index: {}]   ;;  %s4261_s9 = inlined_call_operand.vmem [shape: f32[2,32,384], index: 9, kind: input, shape index: {}]   ;;  %s4262_s10 = inlined_call_operand.vmem [shape: f32[2,1,384], index: 10, kind: input, shape index: {}]   ;;  %s4263_s11 = inlined_call_operand.vmem [shape: f32[2,128,32], index: 11, kind: input, shape index: {}]   ;;  %s4264_s12 = inlined_call_operand.vmem [shape: f32[2,1,32], index: 12, kind: input, shape index: {}]   ;;  %s4265_s13 = inlined_call_operand.vmem [shape: f32[2,4,32], index: 13, kind: input, shape index: {}]   ;;  %s4266_s14 = inlined_call_operand.vmem [shape: f32[2,32,64], index: 14, kind: input, shape index: {}]   ;;  %s4267_s15 = inlined_call_operand.vmem [shape: f32[2,1,64], index: 15, kind: input, shape index: {}]   ;;  %s4268_s16 = inlined_call_operand.vmem [shape: f32[2,64,32], index: 16, kind: input, shape index: {}]   ;;  %s4269_s17 = inlined_call_operand.vmem [shape: f32[2,1,32], index: 17, kind: input, shape index: {}]   ;;  %s4270_s18 = inlined_call_operand.vmem [shape: f32[32,2], index: 18, kind: input, shape index: {}]   ;;  %s4271_s19 = inlined_call_operand.vmem [shape: f32[1,2], index: 19, kind: input, shape index: {}]   ;;  %s4272_s20 = inlined_call_operand.vmem [shape: f32[1,2], index: 20, kind: input, shape index: {}]   ;;  %s4273_s21 = inlined_call_operand.hbm [shape: f32[2,2], index: 21, kind: output, shape index: {}]  }
   0x1   :  { %4278 = sst [smem:[#allocation5_spill]] %s4252_s0 }
   0x2   :  { %4279 = sst [smem:[#allocation6_spill]] %s4253_s1 }
   0x3   :  { %4280 = sst [smem:[#allocation7_spill]] %s4254_s2 }
   0x4   :  { %4281 = sst [smem:[#allocation8_spill]] %s4255_s3 }
   0x5   :  { %4282 = sst [smem:[#allocation9_spill]] %s4256_s4 }
   0x6   :  { %4283 = sst [smem:[#allocation10_spill]] %s4257_s5 }
   0x7   :  { %s4284_s26 = sld [smem:[#allocation5_spill]]  ;;  %s4285_s0 = sld [smem:[#allocation6_spill]]  ;;  %v3543_v3 = vmov 0   ;;  %v3544_v15 = vmov 0.0  }
   0x8   :  { %3455 = vset.pattern.permute.xlu1 %v3543_v3  ;;  %3454 = vset.pattern.permute.xlu0 %v3543_v3  ;;  %s4286_s23 = sld [smem:[#allocation10_spill]] }
   0x9   :  { %349 = vmatprep.mubr.f32.mxu1 %v3544_v15 }
   0xd   :  { %v70_v0 = vld [vmem:[%s4284_s26 + $0x8] sm:$0xff]  ;;  %v69_v1 = vld [vmem:[%s4284_s26] sm:$0xff] }
   0xe   :  { %v72_v2 = vld [vmem:[%s4285_s0 + $0x8] sm:$0xff]  ;;  %v71_v4 = vld [vmem:[%s4285_s0] sm:$0xff]  ;;  %81 = vperm.xlu1 %3455, %v70_v0   ;;  %78 = vperm.xlu0 %3454, %v69_v1   ;;  %v105_v10 = vld [vmem:[%s4286_s23 + $0x10] sm:$0xff] }
   0xf   :  { %v103_v5 = vld [vmem:[%s4286_s23] sm:$0xff]  ;;  %v104_v6 = vld [vmem:[%s4286_s23 + $0x8] sm:$0xff]  ;;  %v74_v7 = vadd.s32 50, %v72_v2  ;;  %v73_v8 = vadd.s32 50, %v71_v4  ;;  %v106_v11 = vld [vmem:[%s4286_s23 + $0x18] sm:$0xff] }
  0x10   :  { %v3287_v9 = vpack.c.bf16 %v104_v6, %v103_v5  ;;  %v3291_v12 = vpack.c.bf16 %v106_v11, %v105_v10  ;;  %v107_v13 = vld [vmem:[%s4286_s23 + $0x20] sm:$0xff]  ;;  %v108_v14 = vld [vmem:[%s4286_s23 + $0x28] sm:$0xff] }
  0x11   :  { %26 = vsyncpa [#allocation3], 0  ;;  %v3295_v16 = vpack.c.bf16 %v108_v14, %v107_v13  ;;  %v109_v17 = vld [vmem:[%s4286_s23 + $0x30] sm:$0xf]  ;;  %vm119_vm0 = vcmask 1043456   ;;  %v75_v18 = vlaneseq  ;;  %vm112_vm5 = vcmask 424960  }
  0x12   :  { %3288 = vmatprep.subr.bf16.mxu0 %v3287_v9  ;;  %93 = vperm.xlu1 %3455, %v74_v7   ;;  %v111_v30 = vld [vmem:[%s4258_s6 + $0x8] sm:$0xff]  ;;  %v110_v31 = vld [vmem:[%s4258_s6] sm:$0xff]  ;;  %vm199_vm6 = vcmask 261120   ;;  %v253_v52 = vld [vmem:[%s4261_s9 + $0x18] sm:$0xff]  ;;  %vm3545_vm7 = vmmov 0   ;;  %s4287_s24 = sld [smem:[#allocation7_spill]] }
  0x13   :  { %3290 = vmatpush3.bf16.msra.mxu0 %v3287_v9  ;;  %90 = vperm.xlu0 %3454, %v73_v8   ;;  %v76_v19 = vand.u32 127, %v75_v18  ;;  %v251_v48 = vld [vmem:[%s4261_s9 + $0x8] sm:$0xff]  ;;  %v254_v49 = vld [vmem:[%s4261_s9 + $0x20] sm:$0xff]  ;;  %v257_v53 = vld [vmem:[%s4261_s9 + $0x38] sm:$0xff]  ;;  %v3739_v4 = vshrl.u32 %v75_v18, 7  ;;  %vm745_vm8 = vcmask 64512  }
  0x14   :  { %3292 = vmatprep.subr.bf16.mxu0 %v3291_v12  ;;  %v250_v50 = vld [vmem:[%s4261_s9] sm:$0xff]  ;;  %v3299_v51 = vpack.c.bf16 %v254_v49, %v251_v48  ;;  %v260_v54 = vld [vmem:[%s4261_s9 + $0x50] sm:$0xff]  ;;  %v259_v58 = vld [vmem:[%s4261_s9 + $0x48] sm:$0xff]  ;;  %vm1352_vm9 = vcmask 523264   ;;  %s4288_s29 = sld [smem:[#allocation8_spill]]  ;;  %s4289_s4 = sld [smem:[#allocation9_spill]] }
  0x15   :  { %v3301_v55 = vpack.c.bf16 %v253_v52, %v250_v50  ;;  %v3303_v56 = vpack.c.bf16 %v260_v54, %v257_v53  ;;  %v256_v57 = vld [vmem:[%s4261_s9 + $0x30] sm:$0xff]  ;;  %v255_v61 = vld [vmem:[%s4261_s9 + $0x28] sm:$0xff]  ;;  %v3742_v6 = vsub.s32 0, %v3739_v4  ;;  %v198_v7 = vld [vmem:[%s4259_s7] sm:$0x3]  ;;  %v3748_v8 = vsub.s32 1, %v3739_v4 }
  0x16   :  { %3300 = vmatprep.subr.bf16.mxu1 %v3299_v51  ;;  %v3305_v59 = vpack.c.bf16 %v259_v58, %v256_v57  ;;  %v252_v60 = vld [vmem:[%s4261_s9 + $0x10] sm:$0xff]  ;;  %v258_v13 = vld [vmem:[%s4261_s9 + $0x40] sm:$0xff]  ;;  %v261_v14 = vld [vmem:[%s4261_s9 + $0x58] sm:$0xff]  ;;  %vm2715_vm13 = vcmask 1041409   ;;  %s3547_s25 = smov [#allocation2]   ;;  %vm2797_vm14 = vcmask 9216  }
  0x17   :  { %3294 = vmatpush3.bf16.msra.mxu0 %v3291_v12  ;;  %3302 = vmatpush1.bf16.msra.mxu1 %v3301_v55  ;;  %v3307_v62 = vpack.c.bf16 %v255_v61, %v252_v60  ;;  %v230_v9 = vrot.slane %v198_v7, %v3742_v6  ;;  %v236_v12 = vrot.slane %v198_v7, %v3748_v8  ;;  %s2805_s26 = sshll.u32 %s3547_s25, 4  ;;  %s2806_s26 = int_to_ptr.vmem [resolvable:$true] %s2805_s26 }
  0x18   :  { %3296 = vmatprep.subr.bf16.mxu0 %v3295_v16  ;;  %3304 = vmatprep.subr.bf16.mxu1 %v3303_v56  ;;  %v240_v48 = vld [vmem:[%s4287_s24 + $0x1] sm:$0x1]  ;;  %p3524_p1 = scmp.lt.s32.totalorder %s2806_s26, %s2806_s26 }
  0x19   :  { %v242_v50 = vcvt.s32.f32 %v240_v48  ;;  %v1090_v48 = vld [vmem:[%s4263_s11 + $0x10] sm:$0xff] }
  0x1b   :  { %3298 = vmatpush3.bf16.msra.mxu0 %v3295_v16  ;;  %3306 = vmatpush1.bf16.msra.mxu1 %v3305_v59  ;;  %v244_v52 = vsub.f32 1.0, %v242_v50 }
  0x1c   :  { %3039 = vmatprep.subr.msk.mxu0 %vm119_vm0, %v109_v17  ;;  %3308 = vmatprep.subr.bf16.mxu1 %v3307_v62 }
  0x1d   :  { %v246_v54 = vmul.f32 -1e+09, %v244_v52 }
  0x1f   :  { %3040 = vmatpush3.msk.msra.mxu0 %vm119_vm0, %v109_v17  ;;  %v3830_v58 = vrot.slane %v246_v54, %v3742_v6 }
  0x20   :  { %3055 = vmatprep.subr.mxu0 %v3544_v15 }
  0x8d   :  { %v82_v20 = vpop.permute.xlu1 %81  ;;  %v79_v21 = vpop.permute.xlu0 %78 }
  0x8e   :  { %vm84_vm1 = vcmp.eq.s32.totalorder %v76_v19, %v82_v20  ;;  %vm83_vm2 = vcmp.eq.s32.totalorder %v76_v19, %v79_v21  ;;  %v3311_v20 = vpack.c.bf16 %v261_v14, %v258_v13 }
  0x8f   :  { %v2814_v24 = vsel %vm84_vm1, 1.0, %v3544_v15  ;;  %v2813_v25 = vsel %vm83_vm2, 1.0, %v3544_v15 }
  0x91   :  { %v94_v22 = vpop.permute.xlu1 %93 }
  0x92   :  { %v91_v23 = vpop.permute.xlu0 %90  ;;  %vm96_vm3 = vcmp.eq.s32.totalorder %v76_v19, %v94_v22 }
  0x93   :  { %vm95_vm4 = vcmp.eq.s32.totalorder %v76_v19, %v91_v23  ;;  %v2816_v26 = vsel %vm96_vm3, 1.0, %v3544_v15  ;;  %v262_v23 = vld [vmem:[%s4262_s10] sm:$0x7] }
  0x94   :  { %v2815_v27 = vsel %vm95_vm4, 1.0, %v3544_v15  ;;  %v102_v28 = vadd.f32 %v2816_v26, %v2814_v24  ;;  %v267_v24 = vrot.slane %v262_v23, %v3742_v6 }
  0x95   :  { %v101_v29 = vadd.f32 %v2815_v27, %v2813_v25  ;;  %v271_v25 = vrot.slane %v262_v23, %v3748_v8 }
  0x97   :  { %3041 = vmatprep.mubr.msk.f32.mxu0 %vm112_vm5, %v101_v29  ;;  %v3784_v29 = vld [vmem:[%s4260_s8] ss:$0 sm:$0xff] }
  0x98   :  { %3042 = vmatmul.mubr.msk.f32.vlgmr.msra.gmra.mrb[0].mxu0 %vm112_vm5, %v102_v28 }
  0x99   :  { %3057 = vmatprep.mubr.msk.f32.mxu0 %vm3545_vm7, %v3544_v15 }
 0x16b   :  { %v3043_v32 = vpop.f32.mrb[0].mxu0 }
 0x16c   :  { %v195_v33 = vadd.f32 %v3043_v32, %v111_v30  ;;  %v189_v34 = vpop.f32.mrb[1].mxu0 }
 0x16d   :  { %v190_v35 = vadd.f32 %v189_v34, %v110_v31  ;;  %v3787_v31 = vsub.s32 2, %v3739_v4 }
 0x16e   :  { %v203_v36 = vsel %vm199_vm6, %v195_v33, 0.0 }
 0x16f   :  { %204 = vadd.xlane.f32.xlu1 %v203_v36  ;;  %v200_v37 = vsel %vm199_vm6, %v190_v35, 0.0  ;;  %v3794_v36 = vld [vmem:[%s4260_s8 + $0x1] ss:$0 sm:$0xff] }
 0x170   :  { %201 = vadd.xlane.f32.xlu0 %v200_v37 }
 0x1fc   :  { %v205_v38 = vpop.xlane.xlu1 %204 }
 0x1fd   :  { %v208_v39 = vmul.f32 0.03125, %v205_v38  ;;  %v202_v40 = vpop.xlane.xlu0 %201  ;;  %v275_v38 = vrot.slane %v262_v23, %v3787_v31 }
 0x1fe   :  { %v207_v41 = vmul.f32 0.03125, %v202_v40 }
 0x1ff   :  { %v210_v42 = vsub.f32 %v195_v33, %v208_v39 }
 0x200   :  { %v209_v43 = vsub.f32 %v190_v35, %v207_v41 }
 0x201   :  { %v212_v46 = vmul.f32 %v210_v42, %v210_v42 }
 0x202   :  { %v211_v44 = vmul.f32 %v209_v43, %v209_v43 }
 0x203   :  { %v216_v47 = vsel %vm199_vm6, %v212_v46, 0.0  ;;  %v239_v46 = vld [vmem:[%s4287_s24] sm:$0x1] }
 0x204   :  { %v213_v45 = vsel %vm199_vm6, %v211_v44, 0.0 }
 0x205   :  { %214 = vadd.xlane.f32.xlu0 %v213_v45 }
 0x209   :  { %217 = vadd.xlane.f32.xlu0 %v216_v47  ;;  %v241_v47 = vcvt.s32.f32 %v239_v46 }
 0x20b   :  { %v243_v49 = vsub.f32 1.0, %v241_v47 }
 0x20d   :  { %v245_v51 = vmul.f32 -1e+09, %v243_v49  ;;  %v1091_v49 = vld [vmem:[%s4263_s11 + $0x18] sm:$0xff] }
 0x20f   :  { %v3826_v53 = vrot.slane %v245_v51, %v3742_v6 }
 0x292   :  { %v215_v63 = vpop.xlane.xlu0 %214 }
 0x293   :  { %v219_v0 = vmul.f32 0.03125, %v215_v63 }
 0x295   :  { %v221_v1 = vadd.f32 1e-05, %v219_v0 }
 0x296   :  { %v218_v2 = vpop.xlane.xlu0 %217 }
 0x297   :  { %3456 = vrsqrt.f32 %v221_v1  ;;  %v220_v3 = vmul.f32 0.03125, %v218_v2 }
 0x299   :  { %v222_v5 = vadd.f32 1e-05, %v220_v3 }
 0x29b   :  { %3458 = vrsqrt.f32 %v222_v5 }
 0x2a1   :  { %v3457_v10 = vpop.eup %3456 }
 0x2a2   :  { %v225_v11 = vmul.f32 %v3457_v10, %v209_v43 }
 0x2a4   :  { %v231_v16 = vmul.f32 %v230_v9, %v225_v11 }
 0x2a5   :  { %v3459_v17 = vpop.eup %3458 }
 0x2a6   :  { %v3758_v18 = vadd.f32 %v236_v12, %v231_v16  ;;  %v226_v19 = vmul.f32 %v3459_v17, %v210_v42 }
 0x2a8   :  { %2821 = vmatmul.mubr.msk.f32.vlgmr.msra.gmra.mrb[0].mxu1 %vm199_vm6, %v3758_v18  ;;  %v232_v21 = vmul.f32 %v230_v9, %v226_v19 }
 0x2a9   :  { %3310 = vmatpush3.bf16.msra.mxu1 %v3307_v62  ;;  %355 = vmatprep.mubr.f32.mxu1 %v3544_v15 }
 0x2aa   :  { %v3763_v22 = vadd.f32 %v236_v12, %v232_v21  ;;  %3312 = vmatprep.subr.bf16.mxu1 %v3311_v20 }
 0x2ac   :  { %2822 = vmatmul.mubr.msk.f32.gmra.mrb[2].mxu1 %vm199_vm6, %v3763_v22 }
 0x2ad   :  { %3314 = vmatpush3.bf16.msra.mxu1 %v3311_v20  ;;  %3052 = vmatprep.mubr.msk.f32.mxu1 %vm199_vm6, %v3758_v18 }
 0x2ae   :  { %3060 = vmatprep.subr.mxu1 %v3544_v15 }
 0x2b0   :  { %3053 = vmatmul.mubr.msk.f32.vlgmr.msra.gmra.mrb[4].mxu1 %vm199_vm6, %v3763_v22 }
 0x2b1   :  { %3062 = vmatprep.mubr.msk.f32.mxu1 %vm3545_vm7, %v3544_v15 }
 0x37b   :  { %v351_v26 = vpop.f32.mrb[0].mxu1 }
 0x37c   :  { %v352_v27 = vadd.f32 %v351_v26, %v267_v24  ;;  %v353_v28 = vpop.f32.mrb[1].mxu1 }
 0x37d   :  { %v354_v30 = vadd.f32 %v353_v28, %v271_v25 }
 0x37e   :  { %v443_v33 = vmul.f32 %v3784_v29, %v352_v27  ;;  %v451_v40 = vmul.f32 %v3794_v36, %v352_v27 }
 0x37f   :  { %v357_v32 = vpop.f32.mrb[2].mxu1  ;;  %3056 = vmatpush3.xpose.msra.mxu0 %v354_v30 }
 0x380   :  { %v358_v34 = vadd.f32 %v357_v32, %v267_v24  ;;  %v359_v35 = vpop.f32.mrb[3].mxu1  ;;  %3065 = vmatprep.subr.mxu0 %v3544_v15 }
 0x381   :  { %v360_v37 = vadd.f32 %v359_v35, %v271_v25 }
 0x382   :  { %3058 = vmatmul.mubr.f32.vlgmr.msra.gmra.mrb[2].mxu0 %v443_v33  ;;  %v444_v41 = vmul.f32 %v3784_v29, %v358_v34  ;;  %v452_v44 = vmul.f32 %v3794_v36, %v358_v34 }
 0x383   :  { %v3054_v39 = vpop.f32.mrb[4].mxu1  ;;  %3061 = vmatpush3.xpose.msra.mxu1 %v360_v37  ;;  %3066 = vmatpush3.xpose.msra.mxu0 %v354_v30 }
 0x384   :  { %v428_v42 = vpop.f32.mrb[5].mxu1  ;;  %3067 = vmatprep.mubr.msk.f32.mxu0 %vm3545_vm7, %v3544_v15  ;;  %3070 = vmatprep.subr.mxu1 %v3544_v15  ;;  %v3810_v45 = vadd.f32 %v3054_v39, %v275_v38 }
 0x385   :  { %v3802_v43 = vadd.f32 %v428_v42, %v275_v38  ;;  %3075 = vmatprep.subr.mxu0 %v3544_v15  ;;  %v1089_v42 = vld [vmem:[%s4263_s11 + $0x8] sm:$0xff] }
 0x386   :  { %3063 = vmatmul.mubr.f32.vlgmr.msra.gmra.mrb[6].mxu1 %v444_v41  ;;  %3068 = vmatmul.mubr.f32.vlgmr.msra.gmra.mrb[4].mxu0 %v451_v40  ;;  %v1088_v41 = vld [vmem:[%s4263_s11] sm:$0xff] }
 0x387   :  { %3071 = vmatpush3.xpose.msra.mxu1 %v360_v37  ;;  %3076 = vmatpush3.msra.mxu0 %v3802_v43  ;;  %v3315_v47 = vpack.c.bf16 %v1089_v42, %v1088_v41 }
 0x388   :  { %3072 = vmatprep.mubr.msk.f32.mxu1 %vm3545_vm7, %v3544_v15  ;;  %3080 = vmatprep.subr.mxu1 %v3544_v15 }
 0x389   :  { %3077 = vmatprep.mubr.msk.f32.mxu0 %vm3545_vm7, %v3544_v15  ;;  %3085 = vmatprep.subr.mxu0 %v3544_v15 }
 0x38a   :  { %3073 = vmatmul.mubr.f32.vlgmr.msra.gmra.mrb[8].mxu1 %v452_v44 }
 0x38b   :  { %3081 = vmatpush3.msra.mxu1 %v3810_v45  ;;  %3082 = vmatprep.mubr.msk.f32.mxu1 %vm3545_vm7, %v3544_v15 }
 0x38c   :  { %3090 = vmatprep.subr.mxu1 %v3544_v15 }
 0x455   :  { %v531_v55 = vpop.f32.mrb[2].mxu0 }
 0x456   :  { %v532_v56 = vadd.f32 %v531_v55, %v3826_v53  ;;  %v3059_v57 = vpop.f32.mrb[3].mxu0  ;;  %v3319_v55 = vpack.c.bf16 %v1091_v49, %v1090_v48 }
 0x457   :  { %v1093_v57 = vld [vmem:[%s4263_s11 + $0x28] sm:$0xff] }
 0x458   :  { %v746_v59 = vsel %vm745_vm8, %v532_v56, -inf }
 0x459   :  { %747 = vmax.xlane.f32.xlu1 %v746_v59  ;;  %v601_v60 = vpop.f32.mrb[6].mxu1  ;;  %v671_v61 = vpop.f32.mrb[4].mxu0 }
 0x45a   :  { %v602_v62 = vadd.f32 %v601_v60, %v3830_v58  ;;  %v672_v63 = vadd.f32 %v671_v61, %v3826_v53  ;;  %v3064_v0 = vpop.f32.mrb[7].mxu1  ;;  %v3069_v1 = vpop.f32.mrb[5].mxu0  ;;  %v1094_v61 = vld [vmem:[%s4263_s11 + $0x30] sm:$0xff] }
 0x45b   :  { %v1097_v0 = vld [vmem:[%s4263_s11 + $0x48] sm:$0xff] }
 0x45c   :  { %v752_v2 = vsel %vm745_vm8, %v672_v63, -inf  ;;  %v749_v3 = vsel %vm745_vm8, %v602_v62, -inf }
 0x45d   :  { %753 = vmax.xlane.f32.xlu1 %v752_v2  ;;  %750 = vmax.xlane.f32.xlu0 %v749_v3  ;;  %v741_v5 = vpop.f32.mrb[8].mxu1  ;;  %v1098_v2 = vld [vmem:[%s4263_s11 + $0x50] sm:$0xff]  ;;  %v1099_v3 = vld [vmem:[%s4263_s11 + $0x58] sm:$0xff] }
 0x45e   :  { %v742_v7 = vadd.f32 %v741_v5, %v3830_v58  ;;  %v3074_v9 = vpop.f32.mrb[9].mxu1  ;;  %v3335_v5 = vpack.c.bf16 %v1099_v3, %v1098_v2 }
 0x45f   :  { %v1101_v9 = vld [vmem:[%s4263_s11 + $0x68] sm:$0xff] }
 0x460   :  { %v755_v10 = vsel %vm745_vm8, %v742_v7, -inf }
 0x461   :  { %756 = vmax.xlane.f32.xlu0 %v755_v10 }
 0x4e6   :  { %v748_v11 = vpop.xlane.xlu1 %747 }
 0x4e7   :  { %v758_v12 = vsub.f32 %v532_v56, %v748_v11  ;;  %v1092_v56 = vld [vmem:[%s4263_s11 + $0x20] sm:$0xff]  ;;  %v1102_v11 = vld [vmem:[%s4263_s11 + $0x70] sm:$0xff] }
 0x4e8   :  { %v3323_v59 = vpack.c.bf16 %v1093_v57, %v1092_v56  ;;  %v1229_v57 = vld [vmem:[%s4266_s14 + $0x10] sm:$0xff] }
 0x4e9   :  { %v762_v13 = vmul.f32 1.442695, %v758_v12  ;;  %v1103_v12 = vld [vmem:[%s4263_s11 + $0x78] sm:$0xff] }
 0x4ea   :  { %v754_v14 = vpop.xlane.xlu1 %753  ;;  %v751_v16 = vpop.xlane.xlu0 %750 }
 0x4eb   :  { %3460 = vpow2.f32 %v762_v13  ;;  %v760_v17 = vsub.f32 %v672_v63, %v754_v14  ;;  %v759_v19 = vsub.f32 %v602_v62, %v751_v16  ;;  %v1095_v62 = vld [vmem:[%s4263_s11 + $0x38] sm:$0xff]  ;;  %v3343_v13 = vpack.c.bf16 %v1103_v12, %v1102_v11 }
 0x4ec   :  { %v3327_v63 = vpack.c.bf16 %v1095_v62, %v1094_v61 }
 0x4ed   :  { %v766_v20 = vmul.f32 1.442695, %v760_v17  ;;  %v764_v21 = vmul.f32 1.442695, %v759_v19 }
 0x4ee   :  { %v757_v23 = vpop.xlane.xlu0 %756 }
 0x4ef   :  { %3462 = vpow2.f32 %v766_v20  ;;  %v761_v24 = vsub.f32 %v742_v7, %v757_v23  ;;  %v1100_v7 = vld [vmem:[%s4263_s11 + $0x60] sm:$0xff] }
 0x4f0   :  { %3464 = vpow2.f32 %v764_v21  ;;  %v3339_v10 = vpack.c.bf16 %v1101_v9, %v1100_v7 }
 0x4f1   :  { %v768_v25 = vmul.f32 1.442695, %v761_v24 }
 0x4f3   :  { %3466 = vpow2.f32 %v768_v25 }
 0x4f5   :  { %v3461_v26 = vpop.eup %3460 }
 0x4f6   :  { %v770_v27 = vsel %vm745_vm8, %v3461_v26, 0.0 }
 0x4f7   :  { %771 = vadd.xlane.f32.xlu1 %v770_v27 }
 0x4f9   :  { %v3463_v28 = vpop.eup %3462 }
 0x4fa   :  { %v3465_v30 = vpop.eup %3464  ;;  %v776_v32 = vsel %vm745_vm8, %v3463_v28, 0.0 }
 0x4fb   :  { %777 = vadd.xlane.f32.xlu1 %v776_v32  ;;  %v773_v33 = vsel %vm745_vm8, %v3465_v30, 0.0 }
 0x4fc   :  { %774 = vadd.xlane.f32.xlu0 %v773_v33  ;;  %v2831_v33 = vld [vmem:[%s4264_s12] ss:$0 sm:$0xff] }
 0x4fd   :  { %v3467_v34 = vpop.eup %3466 }
 0x4fe   :  { %v779_v35 = vsel %vm745_vm8, %v3467_v34, 0.0 }
 0x500   :  { %780 = vadd.xlane.f32.xlu0 %v779_v35 }
 0x584   :  { %v772_v37 = vpop.xlane.xlu1 %771 }
 0x585   :  { %3468 = vrcp.f32 %v772_v37 }
 0x588   :  { %v778_v38 = vpop.xlane.xlu1 %777 }
 0x589   :  { %3470 = vrcp.f32 %v778_v38  ;;  %v775_v39 = vpop.xlane.xlu0 %774 }
 0x58a   :  { %3472 = vrcp.f32 %v775_v39 }
 0x58d   :  { %v781_v40 = vpop.xlane.xlu0 %780 }
 0x58e   :  { %3474 = vrcp.f32 %v781_v40 }
 0x58f   :  { %v3469_v44 = vpop.eup %3468 }
 0x590   :  { %v786_v46 = vmul.f32 %v3469_v44, %v3461_v26 }
 0x592   :  { %3078 = vmatmul.mubr.msk.f32.vlgmr.msra.gmra.mrb[6].mxu0 %vm745_vm8, %v786_v46 }
 0x593   :  { %v3471_v50 = vpop.eup %3470  ;;  %3086 = vmatpush3.msra.mxu0 %v3802_v43  ;;  %3087 = vmatprep.mubr.msk.f32.mxu0 %vm3545_vm7, %v3544_v15 }
 0x594   :  { %v3473_v51 = vpop.eup %3472  ;;  %v788_v52 = vmul.f32 %v3471_v50, %v3463_v28  ;;  %3316 = vmatprep.subr.bf16.mxu0 %v3315_v47 }
 0x595   :  { %v787_v54 = vmul.f32 %v3473_v51, %v3465_v30 }
 0x596   :  { %3088 = vmatmul.mubr.msk.f32.vlgmr.msra.gmra.mrb[8].mxu0 %vm745_vm8, %v788_v52 }
 0x597   :  { %3083 = vmatmul.mubr.msk.f32.vlgmr.msra.gmra.mrb[10].mxu1 %vm745_vm8, %v787_v54  ;;  %3318 = vmatpush3.bf16.msra.mxu0 %v3315_v47 }
 0x598   :  { %v3475_v43 = vpop.eup %3474  ;;  %3091 = vmatpush3.msra.mxu1 %v3810_v45  ;;  %3092 = vmatprep.mubr.msk.f32.mxu1 %vm3545_vm7, %v3544_v15  ;;  %v1096_v45 = vld [vmem:[%s4263_s11 + $0x40] sm:$0xff] }
 0x599   :  { %v789_v60 = vmul.f32 %v3475_v43, %v3467_v34  ;;  %3320 = vmatprep.subr.bf16.mxu0 %v3319_v55  ;;  %v3331_v1 = vpack.c.bf16 %v1097_v0, %v1096_v45  ;;  %v1230_v43 = vld [vmem:[%s4266_s14 + $0x18] sm:$0xff] }
 0x59b   :  { %3093 = vmatmul.mubr.msk.f32.vlgmr.msra.gmra.mrb[12].mxu1 %vm745_vm8, %v789_v60  ;;  %3322 = vmatpush3.bf16.msra.mxu0 %v3319_v55  ;;  %v1228_v55 = vld [vmem:[%s4266_s14 + $0x8] sm:$0xff] }
 0x59c   :  { %3324 = vmatprep.subr.bf16.mxu0 %v3323_v59 }
 0x59f   :  { %3326 = vmatpush3.bf16.msra.mxu0 %v3323_v59  ;;  %v3351_v59 = vpack.c.bf16 %v1230_v43, %v1229_v57  ;;  %v2835_v57 = vld [vmem:[%s4269_s17] ss:$0 sm:$0xff] }
 0x5a0   :  { %3328 = vmatprep.subr.bf16.mxu0 %v3327_v63 }
 0x5a3   :  { %3330 = vmatpush3.bf16.msra.mxu0 %v3327_v63 }
 0x5a4   :  { %3332 = vmatprep.subr.bf16.mxu0 %v3331_v1 }
 0x5a7   :  { %3334 = vmatpush3.bf16.msra.mxu0 %v3331_v1  ;;  %v3929_v1 = vld [vmem:[%s4265_s13] sm:$0xf] }
 0x5a8   :  { %3336 = vmatprep.subr.bf16.mxu0 %v3335_v5  ;;  %v1218_v2 = vrot.slane %v3929_v1, %v3742_v6 }
 0x5ab   :  { %3338 = vmatpush3.bf16.msra.mxu0 %v3335_v5 }
 0x5ac   :  { %3340 = vmatprep.subr.bf16.mxu0 %v3339_v10 }
 0x5af   :  { %3342 = vmatpush3.bf16.msra.mxu0 %v3339_v10  ;;  %v1224_v10 = vrot.slane %v3929_v1, %v3748_v8 }
 0x5b0   :  { %3344 = vmatprep.subr.bf16.mxu0 %v3343_v13 }
 0x5b3   :  { %3346 = vmatpush3.bf16.msra.mxu0 %v3343_v13 }
 0x665   :  { %v859_v14 = vpop.f32.mrb[6].mxu0 }
 0x666   :  { %v3079_v16 = vpop.f32.mrb[7].mxu0  ;;  %v1082_v19 = vmul.f32 %v3784_v29, %v859_v14 }
 0x667   :  { %v1337_v16 = vld [vmem:[%s4268_s16] sm:$0xff] }
 0x669   :  { %v1005_v17 = vpop.f32.mrb[8].mxu0 }
 0x66a   :  { %v932_v20 = vpop.f32.mrb[10].mxu1  ;;  %v1084_v21 = vmul.f32 %v3794_v36, %v1005_v17  ;;  %v3089_v23 = vpop.f32.mrb[9].mxu0  ;;  %v1338_v17 = vld [vmem:[%s4268_s16 + $0x8] sm:$0xff] }
 0x66b   :  { %v3084_v24 = vpop.f32.mrb[11].mxu1  ;;  %v1083_v27 = vmul.f32 %v3784_v29, %v932_v20  ;;  %v1339_v20 = vld [vmem:[%s4268_s16 + $0x10] sm:$0xff] }
 0x66c   :  { %v1086_v25 = vadd.f32 %v1084_v21, %v1082_v19  ;;  %v3355_v19 = vpack.c.bf16 %v1338_v17, %v1337_v16  ;;  %v1340_v21 = vld [vmem:[%s4268_s16 + $0x18] sm:$0xff]  ;;  %v1341_v24 = vld [vmem:[%s4268_s16 + $0x20] sm:$0xff] }
 0x66d   :  { %v3359_v23 = vpack.c.bf16 %v1340_v21, %v1339_v20  ;;  %v2842_v17 = vld [vmem:[%s4261_s9 + $0x80] sm:$0xff]  ;;  %v2841_v21 = vld [vmem:[%s4261_s9 + $0x78] sm:$0xff] }
 0x66e   :  { %v1078_v26 = vpop.f32.mrb[12].mxu1  ;;  %3127 = vmatprep.mubr.f32.mxu0 %v1086_v25  ;;  %v1342_v25 = vld [vmem:[%s4268_s16 + $0x28] sm:$0xff]  ;;  %v2838_v20 = vld [vmem:[%s4261_s9 + $0x60] sm:$0xff] }
 0x66f   :  { %v1085_v28 = vmul.f32 %v3794_v36, %v1078_v26  ;;  %v3094_v30 = vpop.f32.mrb[13].mxu1  ;;  %v3363_v26 = vpack.c.bf16 %v1342_v25, %v1341_v24  ;;  %v3373_v24 = vpack.c.bf16 %v2841_v21, %v2838_v20  ;;  %v2843_v25 = vld [vmem:[%s4261_s9 + $0x88] sm:$0xff] }
 0x671   :  { %v1087_v32 = vadd.f32 %v1085_v28, %v1083_v27  ;;  %v1343_v27 = vld [vmem:[%s4268_s16 + $0x30] sm:$0xff]  ;;  %v1344_v28 = vld [vmem:[%s4268_s16 + $0x38] sm:$0xff] }
 0x672   :  { %v3367_v30 = vpack.c.bf16 %v1344_v28, %v1343_v27  ;;  %v2845_v27 = vld [vmem:[%s4261_s9 + $0x98] sm:$0xff]  ;;  %v2848_v28 = vld [vmem:[%s4261_s9 + $0xb0] sm:$0xff] }
 0x673   :  { %3128 = vmatmul.mubr.f32.vlgmr.msra.gmra.mrb[10].mxu0 %v1087_v32  ;;  %v2832_v32 = vld [vmem:[%s4267_s15] ss:$0 sm:$0xff] }
 0x746   :  { %v3129_v34 = vpop.f32.mrb[10].mxu0 }
 0x747   :  { %v1183_v35 = vadd.f32 %v3129_v34, %v2831_v33  ;;  %v1177_v37 = vpop.f32.mrb[11].mxu0 }
 0x748   :  { %v1178_v38 = vadd.f32 %v2831_v33, %v1177_v37 }
 0x749   :  { %v1188_v39 = vadd.f32 %v1183_v35, %v3763_v22 }
 0x74a   :  { %v1187_v40 = vadd.f32 %v1178_v38, %v3758_v18  ;;  %v1227_v18 = vld [vmem:[%s4266_s14] sm:$0xff] }
 0x74b   :  { %v1192_v41 = vsel %vm199_vm6, %v1188_v39, 0.0  ;;  %v3347_v56 = vpack.c.bf16 %v1228_v55, %v1227_v18 }
 0x74c   :  { %1193 = vadd.xlane.f32.xlu0 %v1192_v41  ;;  %v1189_v42 = vsel %vm199_vm6, %v1187_v40, 0.0 }
 0x74d   :  { %1190 = vadd.xlane.f32.xlu1 %v1189_v42  ;;  %3348 = vmatprep.subr.bf16.mxu1 %v3347_v56 }
 0x74e   :  { %3350 = vmatpush3.bf16.msra.mxu1 %v3347_v56 }
 0x74f   :  { %3352 = vmatprep.subr.bf16.mxu1 %v3351_v59 }
 0x752   :  { %3354 = vmatpush3.bf16.msra.mxu1 %v3351_v59 }
 0x753   :  { %3356 = vmatprep.subr.bf16.mxu1 %v3355_v19 }
 0x7d9   :  { %v1194_v44 = vpop.xlane.xlu0 %1193 }
 0x7da   :  { %v1196_v46 = vmul.f32 0.03125, %v1194_v44  ;;  %v1191_v47 = vpop.xlane.xlu1 %1190 }
 0x7db   :  { %v1195_v48 = vmul.f32 0.03125, %v1191_v47 }
 0x7dc   :  { %v1198_v49 = vsub.f32 %v1188_v39, %v1196_v46 }
 0x7dd   :  { %v1197_v50 = vsub.f32 %v1187_v40, %v1195_v48 }
 0x7de   :  { %v1200_v51 = vmul.f32 %v1198_v49, %v1198_v49 }
 0x7df   :  { %v1199_v52 = vmul.f32 %v1197_v50, %v1197_v50 }
 0x7e0   :  { %v1204_v54 = vsel %vm199_vm6, %v1200_v51, 0.0 }
 0x7e1   :  { %1205 = vadd.xlane.f32.xlu0 %v1204_v54  ;;  %v1201_v22 = vsel %vm199_vm6, %v1199_v52, 0.0 }
 0x7e2   :  { %1202 = vadd.xlane.f32.xlu1 %v1201_v22 }
 0x86e   :  { %v1206_v60 = vpop.xlane.xlu0 %1205 }
 0x86f   :  { %v1208_v61 = vmul.f32 0.03125, %v1206_v60  ;;  %v1203_v62 = vpop.xlane.xlu1 %1202 }
 0x870   :  { %v1207_v63 = vmul.f32 0.03125, %v1203_v62 }
 0x871   :  { %v1210_v45 = vadd.f32 1e-05, %v1208_v61 }
 0x872   :  { %v1209_v0 = vadd.f32 1e-05, %v1207_v63 }
 0x873   :  { %3476 = vrsqrt.f32 %v1210_v45 }
 0x874   :  { %3478 = vrsqrt.f32 %v1209_v0 }
 0x87d   :  { %v3477_v3 = vpop.eup %3476 }
 0x87e   :  { %v3479_v5 = vpop.eup %3478  ;;  %v1214_v7 = vmul.f32 %v3477_v3, %v1198_v49 }
 0x87f   :  { %v1213_v9 = vmul.f32 %v3479_v5, %v1197_v50 }
 0x880   :  { %v1220_v11 = vmul.f32 %v1218_v2, %v1214_v7 }
 0x881   :  { %v1219_v12 = vmul.f32 %v1218_v2, %v1213_v9 }
 0x882   :  { %v1226_v14 = vadd.f32 %v1224_v10, %v1220_v11 }
 0x883   :  { %v1225_v13 = vadd.f32 %v1224_v10, %v1219_v12 }
 0x885   :  { %3138 = vmatprep.mubr.msk.f32.mxu1 %vm199_vm6, %v1225_v13 }
 0x886   :  { %3139 = vmatmul.mubr.msk.f32.vlgmr.msra.gmra.mrb[14].mxu1 %vm199_vm6, %v1226_v14 }
 0x887   :  { %3358 = vmatpush3.bf16.msra.mxu1 %v3355_v19 }
 0x888   :  { %3360 = vmatprep.subr.bf16.mxu1 %v3359_v23 }
 0x88b   :  { %3362 = vmatpush3.bf16.msra.mxu1 %v3359_v23  ;;  %v2840_v23 = vld [vmem:[%s4261_s9 + $0x70] sm:$0xff] }
 0x88c   :  { %3364 = vmatprep.subr.bf16.mxu1 %v3363_v26 }
 0x88f   :  { %3366 = vmatpush3.bf16.msra.mxu1 %v3363_v26  ;;  %v3379_v26 = vpack.c.bf16 %v2843_v25, %v2840_v23 }
 0x890   :  { %3368 = vmatprep.subr.bf16.mxu1 %v3367_v30 }
 0x891   :  { %3380 = vmatprep.subr.bf16.mxu0 %v3379_v26 }
 0x892   :  { %3382 = vmatpush3.bf16.msra.mxu0 %v3379_v26 }
 0x893   :  { %3370 = vmatpush3.bf16.msra.mxu1 %v3367_v30  ;;  %v2844_v30 = vld [vmem:[%s4261_s9 + $0x90] sm:$0xff] }
 0x959   :  { %v3140_v33 = vpop.f32.mrb[14].mxu1 }
 0x95a   :  { %v1316_v34 = vadd.f32 %v3140_v33, %v2832_v32  ;;  %v1310_v35 = vpop.f32.mrb[15].mxu1  ;;  %v2847_v33 = vld [vmem:[%s4261_s9 + $0xa8] sm:$0xff] }
 0x95b   :  { %v1311_v37 = vadd.f32 %v2832_v32, %v1310_v35  ;;  %v3375_v32 = vpack.c.bf16 %v2848_v28, %v2845_v27  ;;  %v2849_v35 = vld [vmem:[%s4261_s9 + $0xb8] sm:$0xff] }
 0x95c   :  { %v1322_v38 = vmul.f32 0.044715, %v1316_v34  ;;  %v1320_v18 = vmul.f32 0.5, %v1316_v34 }
 0x95d   :  { %v1321_v39 = vmul.f32 0.044715, %v1311_v37  ;;  %v1319_v54 = vmul.f32 0.5, %v1311_v37 }
 0x95e   :  { %v1324_v40 = vmul.f32 %v1322_v38, %v1316_v34 }
 0x95f   :  { %v1323_v41 = vmul.f32 %v1321_v39, %v1311_v37 }
 0x960   :  { %v1326_v42 = vmul.f32 %v1324_v40, %v1316_v34 }
 0x961   :  { %v1325_v44 = vmul.f32 %v1323_v41, %v1311_v37 }
 0x962   :  { %v1328_v46 = vadd.f32 %v1326_v42, %v1316_v34  ;;  %v2846_v34 = vld [vmem:[%s4261_s9 + $0xa0] sm:$0xff] }
 0x963   :  { %v1327_v47 = vadd.f32 %v1325_v44, %v1311_v37  ;;  %v3377_v37 = vpack.c.bf16 %v2847_v33, %v2844_v30  ;;  %v3383_v38 = vpack.c.bf16 %v2849_v35, %v2846_v34 }
 0x964   :  { %v1330_v48 = vmul.f32 0.7978846, %v1328_v46 }
 0x965   :  { %v1329_v49 = vmul.f32 0.7978846, %v1327_v47  ;;  %3384 = vmatprep.subr.bf16.mxu0 %v3383_v38  ;;  %v1470_v47 = vsub.s32 3, %v3739_v4  ;;  %v2900_v4 = vld [vmem:[%s4272_s20] ss:$0 sm:$0xff] }
 0x966   :  { %3480 = vtanh.f32 %v1330_v48  ;;  %3386 = vmatpush3.bf16.msra.mxu0 %v3383_v38  ;;  %v1465_v48 = vrot.slane %v3929_v1, %v3787_v31 }
 0x967   :  { %3482 = vtanh.f32 %v1329_v49  ;;  %3176 = vmatprep.subr.mxu0 %v3544_v15 }
 0x970   :  { %v3481_v50 = vpop.eup %3480 }
 0x971   :  { %v3483_v51 = vpop.eup %3482  ;;  %v1334_v52 = vadd.f32 1.0, %v3481_v50 }
 0x972   :  { %v1333_v22 = vadd.f32 1.0, %v3483_v51 }
 0x973   :  { %v1336_v56 = vmul.f32 %v1334_v52, %v1320_v18 }
 0x974   :  { %v1335_v55 = vmul.f32 %v1333_v22, %v1319_v54  ;;  %v1471_v54 = vrot.slane %v3929_v1, %v1470_v47  ;;  %v2850_v1 = vld [vmem:[%s4262_s10 + $0x3] sm:$0x7] }
 0x976   :  { %3157 = vmatprep.mubr.msk.f32.mxu1 %vm1352_vm9, %v1335_v55 }
 0x977   :  { %3158 = vmatmul.mubr.msk.f32.vlgmr.msra.gmra.mrb[16].mxu1 %vm1352_vm9, %v1336_v56 }
 0x978   :  { %1575 = vmatprep.mubr.f32.mxu1 %v3544_v15 }
 0xa4a   :  { %v3159_v43 = vpop.f32.mrb[16].mxu1 }
 0xa4b   :  { %v1431_v59 = vadd.f32 %v3159_v43, %v2835_v57  ;;  %v1425_v60 = vpop.f32.mrb[17].mxu1  ;;  %v1497_v43 = vrot.slane %v2850_v1, %v3748_v8 }
 0xa4c   :  { %v1426_v61 = vadd.f32 %v2835_v57, %v1425_v60  ;;  %v1493_v57 = vrot.slane %v2850_v1, %v3742_v6 }
 0xa4d   :  { %v1435_v62 = vadd.f32 %v1431_v59, %v1226_v14 }
 0xa4e   :  { %v1434_v63 = vadd.f32 %v1426_v61, %v1225_v13  ;;  %v2839_v13 = vld [vmem:[%s4261_s9 + $0x68] sm:$0xff] }
 0xa4f   :  { %v1439_v45 = vsel %vm199_vm6, %v1435_v62, 0.0  ;;  %v3371_v19 = vpack.c.bf16 %v2842_v17, %v2839_v13 }
 0xa50   :  { %1440 = vadd.xlane.f32.xlu0 %v1439_v45  ;;  %v1436_v0 = vsel %vm199_vm6, %v1434_v63, 0.0 }
 0xa51   :  { %1437 = vadd.xlane.f32.xlu1 %v1436_v0  ;;  %3372 = vmatprep.subr.bf16.mxu1 %v3371_v19 }
 0xa52   :  { %3374 = vmatpush1.bf16.msra.mxu1 %v3373_v24 }
 0xa53   :  { %3376 = vmatprep.subr.bf16.mxu1 %v3375_v32 }
 0xa56   :  { %3378 = vmatpush1.bf16.msra.mxu1 %v3377_v37 }
 0xa57   :  { %3171 = vmatprep.subr.mxu1 %v3544_v15 }
 0xadd   :  { %v1441_v2 = vpop.xlane.xlu0 %1440 }
 0xade   :  { %v1443_v3 = vmul.f32 0.03125, %v1441_v2  ;;  %v1438_v5 = vpop.xlane.xlu1 %1437 }
 0xadf   :  { %v1442_v7 = vmul.f32 0.03125, %v1438_v5 }
 0xae0   :  { %v1445_v9 = vsub.f32 %v1435_v62, %v1443_v3 }
 0xae1   :  { %v1444_v10 = vsub.f32 %v1434_v63, %v1442_v7  ;;  %v1501_v7 = vrot.slane %v2850_v1, %v3787_v31 }
 0xae2   :  { %v1447_v11 = vmul.f32 %v1445_v9, %v1445_v9 }
 0xae3   :  { %v1446_v12 = vmul.f32 %v1444_v10, %v1444_v10 }
 0xae4   :  { %v1451_v16 = vsel %vm199_vm6, %v1447_v11, 0.0 }
 0xae5   :  { %1452 = vadd.xlane.f32.xlu0 %v1451_v16  ;;  %v1448_v14 = vsel %vm199_vm6, %v1446_v12, 0.0 }
 0xae6   :  { %1449 = vadd.xlane.f32.xlu1 %v1448_v14 }
 0xb72   :  { %v1453_v39 = vpop.xlane.xlu0 %1452 }
 0xb73   :  { %v1455_v40 = vmul.f32 0.03125, %v1453_v39  ;;  %v1450_v41 = vpop.xlane.xlu1 %1449 }
 0xb74   :  { %v1454_v42 = vmul.f32 0.03125, %v1450_v41 }
 0xb75   :  { %v1457_v44 = vadd.f32 1e-05, %v1455_v40 }
 0xb76   :  { %v1456_v46 = vadd.f32 1e-05, %v1454_v42 }
 0xb77   :  { %3484 = vrsqrt.f32 %v1457_v44 }
 0xb78   :  { %3486 = vrsqrt.f32 %v1456_v46 }
 0xb81   :  { %v3485_v49 = vpop.eup %3484 }
 0xb82   :  { %v3487_v50 = vpop.eup %3486  ;;  %v1461_v51 = vmul.f32 %v3485_v49, %v1445_v9 }
 0xb83   :  { %v1460_v52 = vmul.f32 %v3487_v50, %v1444_v10 }
 0xb84   :  { %v1467_v22 = vmul.f32 %v1465_v48, %v1461_v51 }
 0xb85   :  { %v1466_v18 = vmul.f32 %v1465_v48, %v1460_v52 }
 0xb86   :  { %v4020_v56 = vadd.f32 %v1471_v54, %v1467_v22 }
 0xb87   :  { %v4018_v55 = vadd.f32 %v1471_v54, %v1466_v18 }
 0xb89   :  { %2851 = vmatmul.mubr.msk.f32.vlgmr.msra.gmra.mrb[18].mxu1 %vm199_vm6, %v4018_v55  ;;  %3168 = vmatprep.mubr.msk.f32.mxu0 %vm199_vm6, %v4018_v55 }
 0xb8a   :  { %3169 = vmatmul.mubr.msk.f32.vlgmr.msra.gmra.mrb[12].mxu0 %vm199_vm6, %v4020_v56  ;;  %1581 = vmatprep.mubr.f32.mxu1 %v3544_v15 }
 0xb8b   :  { %3178 = vmatprep.mubr.msk.f32.mxu0 %vm3545_vm7, %v3544_v15 }
 0xb8d   :  { %2852 = vmatmul.mubr.msk.f32.gmra.mrb[20].mxu1 %vm199_vm6, %v4020_v56 }
 0xb8e   :  { %3173 = vmatprep.mubr.msk.f32.mxu1 %vm3545_vm7, %v3544_v15 }
 0xc5c   :  { %v1577_v59 = vpop.f32.mrb[18].mxu1 }
 0xc5d   :  { %v1578_v60 = vadd.f32 %v1577_v59, %v1493_v57  ;;  %v1579_v61 = vpop.f32.mrb[19].mxu1  ;;  %v3170_v62 = vpop.f32.mrb[12].mxu0 }
 0xc5e   :  { %v1580_v63 = vadd.f32 %v1579_v61, %v1497_v43  ;;  %v1654_v45 = vpop.f32.mrb[13].mxu0  ;;  %v2859_v61 = vld [vmem:[%s4263_s11 + $0x80] sm:$0xff] }
 0xc5f   :  { %v1663_v2 = vmul.f32 %v3784_v29, %v1578_v60  ;;  %v1665_v10 = vmul.f32 %v3794_v36, %v1578_v60  ;;  %v4048_v12 = vadd.f32 %v1654_v45, %v1501_v7 }
 0xc60   :  { %v1583_v0 = vpop.f32.mrb[20].mxu1  ;;  %3172 = vmatpush3.xpose.msra.mxu1 %v1580_v63 }
 0xc61   :  { %v1584_v3 = vadd.f32 %v1583_v0, %v1493_v57  ;;  %v1585_v5 = vpop.f32.mrb[21].mxu1  ;;  %3181 = vmatprep.subr.mxu1 %v3544_v15 }
 0xc62   :  { %v1586_v9 = vadd.f32 %v1585_v5, %v1497_v43 }
 0xc63   :  { %3174 = vmatmul.mubr.f32.vlgmr.msra.gmra.mrb[22].mxu1 %v1663_v2  ;;  %v1664_v11 = vmul.f32 %v3784_v29, %v1584_v3  ;;  %v1666_v16 = vmul.f32 %v3794_v36, %v1584_v3  ;;  %v4056_v29 = vadd.f32 %v3170_v62, %v1501_v7  ;;  %v2860_v62 = vld [vmem:[%s4263_s11 + $0x88] sm:$0xff]  ;;  %v2861_v2 = vld [vmem:[%s4263_s11 + $0x90] sm:$0xff]  ;;  %v2862_v3 = vld [vmem:[%s4263_s11 + $0x98] sm:$0xff] }
 0xc64   :  { %3177 = vmatpush3.xpose.msra.mxu0 %v1586_v9  ;;  %3182 = vmatpush3.xpose.msra.mxu1 %v1580_v63  ;;  %v3387_v0 = vpack.c.bf16 %v2860_v62, %v2859_v61 }
 0xc65   :  { %3183 = vmatprep.mubr.msk.f32.mxu1 %vm3545_vm7, %v3544_v15  ;;  %3186 = vmatprep.subr.mxu0 %v3544_v15 }
 0xc66   :  { %3191 = vmatprep.subr.mxu1 %v3544_v15 }
 0xc67   :  { %3179 = vmatmul.mubr.f32.vlgmr.msra.gmra.mrb[14].mxu0 %v1664_v11  ;;  %3184 = vmatmul.mubr.f32.vlgmr.msra.gmra.mrb[24].mxu1 %v1665_v10  ;;  %v3391_v11 = vpack.c.bf16 %v2862_v3, %v2861_v2 }
 0xc68   :  { %3187 = vmatpush3.xpose.msra.mxu0 %v1586_v9  ;;  %3192 = vmatpush3.msra.mxu1 %v4048_v12 }
 0xc69   :  { %3188 = vmatprep.mubr.msk.f32.mxu0 %vm3545_vm7, %v3544_v15  ;;  %3196 = vmatprep.subr.mxu0 %v3544_v15 }
 0xc6a   :  { %3193 = vmatprep.mubr.msk.f32.mxu1 %vm3545_vm7, %v3544_v15  ;;  %3201 = vmatprep.subr.mxu1 %v3544_v15 }
 0xc6b   :  { %3189 = vmatmul.mubr.f32.vlgmr.msra.gmra.mrb[16].mxu0 %v1666_v16  ;;  %v2863_v16 = vld [vmem:[%s4263_s11 + $0xa0] sm:$0xff] }
 0xc6c   :  { %3197 = vmatpush3.msra.mxu0 %v4056_v29  ;;  %3198 = vmatprep.mubr.msk.f32.mxu0 %vm3545_vm7, %v3544_v15 }
 0xc6d   :  { %3206 = vmatprep.subr.mxu0 %v3544_v15 }
 0xd36   :  { %v1733_v14 = vpop.f32.mrb[22].mxu1 }
 0xd37   :  { %v1734_v13 = vadd.f32 %v1733_v14, %v3826_v53  ;;  %v3175_v17 = vpop.f32.mrb[23].mxu1  ;;  %v2864_v14 = vld [vmem:[%s4263_s11 + $0xa8] sm:$0xff] }
 0xd38   :  { %v3395_v17 = vpack.c.bf16 %v2864_v14, %v2863_v16  ;;  %v2881_v16 = vld [vmem:[%s4266_s14 + $0x38] sm:$0xff] }
 0xd39   :  { %v1947_v19 = vsel %vm745_vm8, %v1734_v13, -inf }
 0xd3a   :  { %v1803_v20 = vpop.f32.mrb[14].mxu0  ;;  %1948 = vmax.xlane.f32.xlu1 %v1947_v19  ;;  %v1873_v21 = vpop.f32.mrb[24].mxu1  ;;  %v2865_v19 = vld [vmem:[%s4263_s11 + $0xb0] sm:$0xff] }
 0xd3b   :  { %v1804_v23 = vadd.f32 %v1803_v20, %v3830_v58  ;;  %v1874_v24 = vadd.f32 %v1873_v21, %v3826_v53  ;;  %v3180_v25 = vpop.f32.mrb[15].mxu0  ;;  %v3185_v26 = vpop.f32.mrb[25].mxu1  ;;  %v2866_v20 = vld [vmem:[%s4263_s11 + $0xb8] sm:$0xff]  ;;  %v2867_v21 = vld [vmem:[%s4263_s11 + $0xc0] sm:$0xff] }
 0xd3c   :  { %v2869_v25 = vld [vmem:[%s4263_s11 + $0xd0] sm:$0xff]  ;;  %v2870_v26 = vld [vmem:[%s4263_s11 + $0xd8] sm:$0xff] }
 0xd3d   :  { %v1950_v27 = vsel %vm745_vm8, %v1804_v23, -inf  ;;  %v1953_v28 = vsel %vm745_vm8, %v1874_v24, -inf }
 0xd3e   :  { %1951 = vmax.xlane.f32.xlu0 %v1950_v27  ;;  %v1943_v30 = vpop.f32.mrb[16].mxu0  ;;  %1954 = vmax.xlane.f32.xlu1 %v1953_v28  ;;  %v3407_v27 = vpack.c.bf16 %v2870_v26, %v2869_v25  ;;  %v2871_v28 = vld [vmem:[%s4263_s11 + $0xe0] sm:$0xff] }
 0xd3f   :  { %v1944_v32 = vadd.f32 %v1943_v30, %v3830_v58  ;;  %v3190_v33 = vpop.f32.mrb[17].mxu0  ;;  %v2872_v30 = vld [vmem:[%s4263_s11 + $0xe8] sm:$0xff] }
 0xd40   :  { %v2873_v33 = vld [vmem:[%s4263_s11 + $0xf0] sm:$0xff] }
 0xd41   :  { %v1956_v34 = vsel %vm745_vm8, %v1944_v32, -inf }
 0xd42   :  { %1957 = vmax.xlane.f32.xlu0 %v1956_v34  ;;  %v2874_v34 = vld [vmem:[%s4263_s11 + $0xf8] sm:$0xff] }
 0xdc7   :  { %v1949_v35 = vpop.xlane.xlu1 %1948 }
 0xdc8   :  { %v1959_v37 = vsub.f32 %v1734_v13, %v1949_v35  ;;  %v3415_v35 = vpack.c.bf16 %v2874_v34, %v2873_v33 }
 0xdca   :  { %v1963_v38 = vmul.f32 1.442695, %v1959_v37 }
 0xdcb   :  { %v1952_v39 = vpop.xlane.xlu0 %1951  ;;  %v1955_v53 = vpop.xlane.xlu1 %1954 }
 0xdcc   :  { %3488 = vpow2.f32 %v1963_v38  ;;  %v1960_v40 = vsub.f32 %v1804_v23, %v1952_v39  ;;  %v1961_v41 = vsub.f32 %v1874_v24, %v1955_v53  ;;  %v2868_v23 = vld [vmem:[%s4263_s11 + $0xc8] sm:$0xff]  ;;  %s3519_s11 = scalar_lea.vmem %s2806_s26, 32 }
 0xdcd   :  { %v3403_v24 = vpack.c.bf16 %v2868_v23, %v2867_v21  ;;  %v4164_v21 = vld [vmem:[%s4265_s13 + $0x4] sm:$0xf]  ;;  %p3520_p0 = scmp.ne.s32.totalorder %s2806_s26, %s3519_s11  ;;  %p3525_p2 = scmp.lt.s32.totalorder %s3519_s11, %s3519_s11 }
 0xdce   :  { %v1965_v42 = vmul.f32 1.442695, %v1960_v40  ;;  %v1967_v44 = vmul.f32 1.442695, %v1961_v41  ;;  %v3518_v41 = vld [vmem:[%s4260_s8] ss:$0 sm:$0xff]  ;;  %v2422_v23 = vrot.slane %v4164_v21, %v3742_v6 }
 0xdcf   :  { %v1958_v46 = vpop.xlane.xlu0 %1957  ;;  %v2887_v6 = vld [vmem:[%s4268_s16 + $0x48] sm:$0xff]  ;;  %p3526_p3 = por %p3525_p2, %p3524_p1 }
 0xdd0   :  { %3490 = vpow2.f32 %v1965_v42  ;;  %v1962_v48 = vsub.f32 %v1944_v32, %v1958_v46  ;;  %v3411_v32 = vpack.c.bf16 %v2872_v30, %v2871_v28  ;;  %v2428_v28 = vrot.slane %v4164_v21, %v3748_v8  ;;  %v2888_v8 = vld [vmem:[%s4268_s16 + $0x50] sm:$0xff] }
 0xdd1   :  { %3492 = vpow2.f32 %v1967_v44  ;;  %p3527_p4 = pnand %p3526_p3, %p3520_p0 }
 0xdd2   :  { %v1969_v49 = vmul.f32 1.442695, %v1962_v48 }
 0xdd4   :  { %3494 = vpow2.f32 %v1969_v49 }
 0xdd6   :  { %v3489_v58 = vpop.eup %3488 }
 0xdd7   :  { %v1971_v50 = vsel %vm745_vm8, %v3489_v58, 0.0 }
 0xdd8   :  { %1972 = vadd.xlane.f32.xlu1 %v1971_v50 }
 0xdda   :  { %v3491_v51 = vpop.eup %3490 }
 0xddb   :  { %v3493_v52 = vpop.eup %3492  ;;  %v1974_v54 = vsel %vm745_vm8, %v3491_v51, 0.0 }
 0xddc   :  { %1975 = vadd.xlane.f32.xlu0 %v1974_v54  ;;  %v1977_v22 = vsel %vm745_vm8, %v3493_v52, 0.0  ;;  %v2876_v54 = vld [vmem:[%s4264_s12 + $0x1] ss:$0 sm:$0xff] }
 0xddd   :  { %1978 = vadd.xlane.f32.xlu1 %v1977_v22 }
 0xdde   :  { %v3495_v18 = vpop.eup %3494 }
 0xddf   :  { %v1980_v1 = vsel %vm745_vm8, %v3495_v18, 0.0 }
 0xde0   :  { %1981 = vadd.xlane.f32.xlu0 %v1980_v1 }
 0xe65   :  { %v1973_v57 = vpop.xlane.xlu1 %1972 }
 0xe66   :  { %3496 = vrcp.f32 %v1973_v57 }
 0xe69   :  { %v1976_v43 = vpop.xlane.xlu0 %1975 }
 0xe6a   :  { %3498 = vrcp.f32 %v1976_v43  ;;  %v1979_v59 = vpop.xlane.xlu1 %1978 }
 0xe6b   :  { %3500 = vrcp.f32 %v1979_v59 }
 0xe6d   :  { %v1982_v60 = vpop.xlane.xlu0 %1981 }
 0xe6e   :  { %3502 = vrcp.f32 %v1982_v60 }
 0xe70   :  { %v3497_v63 = vpop.eup %3496 }
 0xe71   :  { %v1987_v45 = vmul.f32 %v3497_v63, %v3489_v58 }
 0xe73   :  { %3194 = vmatmul.mubr.msk.f32.vlgmr.msra.gmra.mrb[26].mxu1 %vm745_vm8, %v1987_v45 }
 0xe74   :  { %v3499_v5 = vpop.eup %3498  ;;  %3202 = vmatpush3.msra.mxu1 %v4048_v12  ;;  %3203 = vmatprep.mubr.msk.f32.mxu1 %vm3545_vm7, %v3544_v15 }
 0xe75   :  { %v3501_v7 = vpop.eup %3500  ;;  %v1988_v9 = vmul.f32 %v3499_v5, %v3491_v51  ;;  %3388 = vmatprep.subr.bf16.mxu1 %v3387_v0 }
 0xe76   :  { %v1989_v10 = vmul.f32 %v3501_v7, %v3493_v52 }
 0xe77   :  { %3199 = vmatmul.mubr.msk.f32.vlgmr.msra.gmra.mrb[18].mxu0 %vm745_vm8, %v1988_v9  ;;  %v2879_v9 = vld [vmem:[%s4266_s14 + $0x28] sm:$0xff] }
 0xe78   :  { %v3503_v13 = vpop.eup %3502  ;;  %3204 = vmatmul.mubr.msk.f32.vlgmr.msra.gmra.mrb[28].mxu1 %vm745_vm8, %v1989_v10  ;;  %3207 = vmatpush3.msra.mxu0 %v4056_v29  ;;  %v3399_v29 = vpack.c.bf16 %v2866_v20, %v2865_v19 }
 0xe79   :  { %v1990_v12 = vmul.f32 %v3503_v13, %v3495_v18  ;;  %3208 = vmatprep.mubr.msk.f32.mxu0 %vm3545_vm7, %v3544_v15  ;;  %3390 = vmatpush3.bf16.msra.mxu1 %v3387_v0 }
 0xe7a   :  { %3392 = vmatprep.subr.bf16.mxu1 %v3391_v11 }
 0xe7b   :  { %3209 = vmatmul.mubr.msk.f32.vlgmr.msra.gmra.mrb[20].mxu0 %vm745_vm8, %v1990_v12 }
 0xe7d   :  { %3394 = vmatpush3.bf16.msra.mxu1 %v3391_v11  ;;  %v2880_v11 = vld [vmem:[%s4266_s14 + $0x30] sm:$0xff] }
 0xe7e   :  { %3396 = vmatprep.subr.bf16.mxu1 %v3395_v17  ;;  %v3423_v14 = vpack.c.bf16 %v2881_v16, %v2880_v11 }
 0xe81   :  { %3398 = vmatpush3.bf16.msra.mxu1 %v3395_v17 }
 0xe82   :  { %3400 = vmatprep.subr.bf16.mxu1 %v3399_v29 }
 0xe85   :  { %3402 = vmatpush3.bf16.msra.mxu1 %v3399_v29 }
 0xe86   :  { %3404 = vmatprep.subr.bf16.mxu1 %v3403_v24 }
 0xe89   :  { %3406 = vmatpush3.bf16.msra.mxu1 %v3403_v24 }
 0xe8a   :  { %3408 = vmatprep.subr.bf16.mxu1 %v3407_v27 }
 0xe8d   :  { %3410 = vmatpush3.bf16.msra.mxu1 %v3407_v27 }
 0xe8e   :  { %3412 = vmatprep.subr.bf16.mxu1 %v3411_v32 }
 0xe91   :  { %3414 = vmatpush3.bf16.msra.mxu1 %v3411_v32 }
 0xe92   :  { %3416 = vmatprep.subr.bf16.mxu1 %v3415_v35 }
 0xe95   :  { %3418 = vmatpush3.bf16.msra.mxu1 %v3415_v35  ;;  %v2886_v35 = vld [vmem:[%s4268_s16 + $0x40] sm:$0xff] }
 0xf46   :  { %v2060_v37 = vpop.f32.mrb[26].mxu1 }
 0xf47   :  { %v3195_v38 = vpop.f32.mrb[27].mxu1  ;;  %v2283_v42 = vmul.f32 %v3518_v41, %v2060_v37  ;;  %v3427_v37 = vpack.c.bf16 %v2887_v6, %v2886_v35 }
 0xf48   :  { %v2889_v38 = vld [vmem:[%s4268_s16 + $0x58] sm:$0xff] }
 0xf4a   :  { %v2133_v39 = vpop.f32.mrb[18].mxu0 }
 0xf4b   :  { %v2206_v53 = vpop.f32.mrb[28].mxu1  ;;  %v3200_v40 = vpop.f32.mrb[19].mxu0  ;;  %v2284_v58 = vmul.f32 %v3518_v41, %v2133_v39  ;;  %v3431_v39 = vpack.c.bf16 %v2889_v38, %v2888_v8 }
 0xf4c   :  { %v2285_v44 = vmul.f32 %v3794_v36, %v2206_v53  ;;  %v3205_v46 = vpop.f32.mrb[29].mxu1  ;;  %v2890_v53 = vld [vmem:[%s4268_s16 + $0x60] sm:$0xff]  ;;  %v2891_v40 = vld [vmem:[%s4268_s16 + $0x68] sm:$0xff] }
 0xf4d   :  { %v3435_v41 = vpack.c.bf16 %v2891_v40, %v2890_v53  ;;  %v2696_v53 = vld [vmem:[%s4270_s18 + $0x8] sm:$0xff] }
 0xf4e   :  { %v2287_v48 = vadd.f32 %v2285_v44, %v2283_v42  ;;  %v2279_v49 = vpop.f32.mrb[20].mxu0  ;;  %v2892_v42 = vld [vmem:[%s4268_s16 + $0x70] sm:$0xff]  ;;  %v2893_v44 = vld [vmem:[%s4268_s16 + $0x78] sm:$0xff] }
 0xf4f   :  { %v2286_v50 = vmul.f32 %v3794_v36, %v2279_v49  ;;  %v3210_v51 = vpop.f32.mrb[21].mxu0  ;;  %v3439_v46 = vpack.c.bf16 %v2893_v44, %v2892_v42  ;;  %v2698_v42 = vld [vmem:[%s4270_s18 + $0x18] sm:$0xff]  ;;  %v3546_v44 = vmov 0.0|0.0  }
 0xf50   :  { %3243 = vmatprep.mubr.f32.mxu1 %v2287_v48  ;;  %v2883_v48 = vld [vmem:[%s4267_s15 + $0x1] ss:$0 sm:$0xff] }
 0xf51   :  { %v2288_v52 = vadd.f32 %v2286_v50, %v2284_v58 }
 0xf53   :  { %3244 = vmatmul.mubr.f32.vlgmr.msra.gmra.mrb[30].mxu1 %v2288_v52 }
0x1026   :  { %v3245_v22 = vpop.f32.mrb[30].mxu1 }
0x1027   :  { %v2386_v18 = vadd.f32 %v3245_v22, %v2876_v54  ;;  %v2380_v1 = vpop.f32.mrb[31].mxu1 }
0x1028   :  { %v2381_v57 = vadd.f32 %v2876_v54, %v2380_v1 }
0x1029   :  { %v2392_v43 = vadd.f32 %v2386_v18, %v4020_v56 }
0x102a   :  { %v2391_v59 = vadd.f32 %v2381_v57, %v4018_v55  ;;  %v2878_v55 = vld [vmem:[%s4266_s14 + $0x20] sm:$0xff] }
0x102b   :  { %v2396_v60 = vsel %vm199_vm6, %v2392_v43, 0.0  ;;  %v3419_v10 = vpack.c.bf16 %v2879_v9, %v2878_v55 }
0x102c   :  { %2397 = vadd.xlane.f32.xlu0 %v2396_v60  ;;  %v2393_v36 = vsel %vm199_vm6, %v2391_v59, 0.0 }
0x102d   :  { %2394 = vadd.xlane.f32.xlu1 %v2393_v36  ;;  %3420 = vmatprep.subr.bf16.mxu0 %v3419_v10 }
0x102e   :  { %3422 = vmatpush3.bf16.msra.mxu0 %v3419_v10 }
0x102f   :  { %3424 = vmatprep.subr.bf16.mxu0 %v3423_v14 }
0x1032   :  { %3426 = vmatpush3.bf16.msra.mxu0 %v3423_v14 }
0x1033   :  { %3428 = vmatprep.subr.bf16.mxu0 %v3427_v37 }
0x10b9   :  { %v2398_v61 = vpop.xlane.xlu0 %2397 }
0x10ba   :  { %v2400_v62 = vmul.f32 0.03125, %v2398_v61  ;;  %v2395_v63 = vpop.xlane.xlu1 %2394 }
0x10bb   :  { %v2399_v45 = vmul.f32 0.03125, %v2395_v63 }
0x10bc   :  { %v2402_v0 = vsub.f32 %v2392_v43, %v2400_v62 }
0x10bd   :  { %v2401_v2 = vsub.f32 %v2391_v59, %v2399_v45 }
0x10be   :  { %v2404_v3 = vmul.f32 %v2402_v0, %v2402_v0 }
0x10bf   :  { %v2403_v5 = vmul.f32 %v2401_v2, %v2401_v2 }
0x10c0   :  { %v2408_v7 = vsel %vm199_vm6, %v2404_v3, 0.0 }
0x10c1   :  { %2409 = vadd.xlane.f32.xlu0 %v2408_v7  ;;  %v2405_v56 = vsel %vm199_vm6, %v2403_v5, 0.0  ;;  %v2895_v7 = vld [vmem:[%s4269_s17 + $0x1] ss:$0 sm:$0xff] }
0x10c2   :  { %2406 = vadd.xlane.f32.xlu1 %v2405_v56 }
0x114e   :  { %v2410_v13 = vpop.xlane.xlu0 %2409 }
0x114f   :  { %v2412_v12 = vmul.f32 0.03125, %v2410_v13  ;;  %v2407_v17 = vpop.xlane.xlu1 %2406 }
0x1150   :  { %v2411_v19 = vmul.f32 0.03125, %v2407_v17 }
0x1151   :  { %v2414_v20 = vadd.f32 1e-05, %v2412_v12  ;;  %v2682_v12 = vld [vmem:[%s4289_s4] sm:$0x3] }
0x1152   :  { %v2413_v29 = vadd.f32 1e-05, %v2411_v19 }
0x1153   :  { %3504 = vrsqrt.f32 %v2414_v20 }
0x1154   :  { %3506 = vrsqrt.f32 %v2413_v29 }
0x115d   :  { %v3505_v24 = vpop.eup %3504 }
0x115e   :  { %v3507_v25 = vpop.eup %3506  ;;  %v2418_v26 = vmul.f32 %v3505_v24, %v2402_v0 }
0x115f   :  { %v2417_v27 = vmul.f32 %v3507_v25, %v2401_v2 }
0x1160   :  { %v2424_v30 = vmul.f32 %v2422_v23, %v2418_v26 }
0x1161   :  { %v2423_v32 = vmul.f32 %v2422_v23, %v2417_v27 }
0x1162   :  { %v2430_v34 = vadd.f32 %v2428_v28, %v2424_v30 }
0x1163   :  { %v2429_v33 = vadd.f32 %v2428_v28, %v2423_v32 }
0x1165   :  { %3254 = vmatprep.mubr.msk.f32.mxu0 %vm199_vm6, %v2429_v33 }
0x1166   :  { %3255 = vmatmul.mubr.msk.f32.vlgmr.msra.gmra.mrb[22].mxu0 %vm199_vm6, %v2430_v34 }
0x1167   :  { %3430 = vmatpush3.bf16.msra.mxu0 %v3427_v37 }
0x1168   :  { %3432 = vmatprep.subr.bf16.mxu0 %v3431_v39 }
0x116b   :  { %3434 = vmatpush3.bf16.msra.mxu0 %v3431_v39  ;;  %v2695_v39 = vld [vmem:[%s4270_s18] sm:$0xff] }
0x116c   :  { %3436 = vmatprep.subr.bf16.mxu0 %v3435_v41  ;;  %v3444_v40 = vpack.c.bf16 %v2696_v53, %v2695_v39 }
0x116f   :  { %3438 = vmatpush3.bf16.msra.mxu0 %v3435_v41  ;;  %v2697_v41 = vld [vmem:[%s4270_s18 + $0x10] sm:$0xff] }
0x1170   :  { %3440 = vmatprep.subr.bf16.mxu0 %v3439_v46 }
0x1173   :  { %3442 = vmatpush3.bf16.msra.mxu0 %v3439_v46  ;;  %v3447_v46 = vpack.c.bf16 %v2698_v42, %v2697_v41 }
0x1174   :  { %3443 = vmatprep.subr.bf16.mxu0 %v3546_v44 }
0x1239   :  { %v3256_v49 = vpop.f32.mrb[22].mxu0 }
0x123a   :  { %v2522_v58 = vadd.f32 %v3256_v49, %v2883_v48  ;;  %v2516_v50 = vpop.f32.mrb[23].mxu0 }
0x123b   :  { %v2517_v51 = vadd.f32 %v2883_v48, %v2516_v50 }
0x123c   :  { %v2528_v52 = vmul.f32 0.044715, %v2522_v58  ;;  %v2526_v2 = vmul.f32 0.5, %v2522_v58 }
0x123d   :  { %v2527_v54 = vmul.f32 0.044715, %v2517_v51  ;;  %v2525_v45 = vmul.f32 0.5, %v2517_v51 }
0x123e   :  { %v2530_v22 = vmul.f32 %v2528_v52, %v2522_v58 }
0x123f   :  { %v2529_v18 = vmul.f32 %v2527_v54, %v2517_v51  ;;  %v2672_v54 = vrot.slane %v4164_v21, %v3787_v31  ;;  %v2898_v31 = vld [vmem:[%s4271_s19] ss:$0 sm:$0xff] }
0x1240   :  { %v2532_v1 = vmul.f32 %v2530_v22, %v2522_v58 }
0x1241   :  { %v2531_v57 = vmul.f32 %v2529_v18, %v2517_v51 }
0x1242   :  { %v2534_v43 = vadd.f32 %v2532_v1, %v2522_v58 }
0x1243   :  { %v2533_v59 = vadd.f32 %v2531_v57, %v2517_v51  ;;  %v2678_v57 = vrot.slane %v4164_v21, %v1470_v47 }
0x1244   :  { %v2536_v60 = vmul.f32 0.7978846, %v2534_v43 }
0x1245   :  { %v2535_v36 = vmul.f32 0.7978846, %v2533_v59 }
0x1246   :  { %3508 = vtanh.f32 %v2536_v60 }
0x1247   :  { %3510 = vtanh.f32 %v2535_v36 }
0x1250   :  { %v3509_v61 = vpop.eup %3508 }
0x1251   :  { %v3511_v62 = vpop.eup %3510  ;;  %v2540_v63 = vadd.f32 1.0, %v3509_v61 }
0x1252   :  { %v2539_v0 = vadd.f32 1.0, %v3511_v62 }
0x1253   :  { %v2542_v5 = vmul.f32 %v2540_v63, %v2526_v2 }
0x1254   :  { %v2541_v3 = vmul.f32 %v2539_v0, %v2525_v45 }
0x1256   :  { %3273 = vmatprep.mubr.msk.f32.mxu0 %vm1352_vm9, %v2541_v3 }
0x1257   :  { %3274 = vmatmul.mubr.msk.f32.vlgmr.msra.gmra.mrb[24].mxu0 %vm1352_vm9, %v2542_v5 }
0x1258   :  { %3284 = vmatprep.mubr.msk.f32.mxu0 %vm3545_vm7, %v3544_v15  ;;  %v2681_v15 = vld [vmem:[%s4288_s29] sm:$0x3]  ;;  %3445 = vmatpush3.bf16.msra.mxu0 %v3444_v40 }
0x1259   :  { %v2686_v17 = vadd.f32 %v2682_v12, %v2681_v15  ;;  %v2683_v19 = vsub.f32 %v2681_v15, %v2682_v12  ;;  %3446 = vmatprep.subr.bf16.mxu0 %v3546_v44 }
0x125b   :  { %3512 = vrcp.f32 %v2686_v17  ;;  %v2684_v20 = vand.u32 2147483647, %v2683_v19 }
0x125c   :  { %3448 = vmatpush3.bf16.msra.mxu0 %v3447_v46 }
0x125d   :  { %v2685_v29 = vmul.f32 2.0, %v2684_v20 }
0x1265   :  { %v3513_v23 = vpop.eup %3512 }
0x1266   :  { %v2688_v30 = vmul.f32 %v3513_v23, %v2685_v29 }
0x1268   :  { %vm2689_vm10 = vcmp.ne.f32.partialorder %v2688_v30, %v2688_v30 }
0x1269   :  { %v2690_v37 = vsel %vm2689_vm10, 0.0, %v2688_v30 }
0x126a   :  { %vm2691_vm11 = vcmp.eq.f32.partialorder %v2690_v37, inf }
0x126b   :  { %v2692_v8 = vsel %vm2691_vm11, 3.4028235e+38, %v2690_v37 }
0x126c   :  { %vm2693_vm12 = vcmp.eq.f32.partialorder %v2692_v8, -inf }
0x126d   :  { %v2694_v38 = vsel %vm2693_vm12, -3.4028235e+38, %v2692_v8 }
0x132a   :  { %v3275_v56 = vpop.f32.mrb[24].mxu0 }
0x132b   :  { %v2638_v55 = vadd.f32 %v3275_v56, %v2895_v7  ;;  %v2632_v9 = vpop.f32.mrb[25].mxu0 }
0x132c   :  { %v2633_v10 = vadd.f32 %v2895_v7, %v2632_v9 }
0x132d   :  { %v2642_v11 = vadd.f32 %v2638_v55, %v2430_v34 }
0x132e   :  { %v2641_v16 = vadd.f32 %v2633_v10, %v2429_v33 }
0x132f   :  { %v2646_v14 = vsel %vm199_vm6, %v2642_v11, 0.0 }
0x1330   :  { %2647 = vadd.xlane.f32.xlu1 %v2646_v14  ;;  %v2643_v13 = vsel %vm199_vm6, %v2641_v16, 0.0 }
0x1331   :  { %2644 = vadd.xlane.f32.xlu0 %v2643_v13 }
0x13bd   :  { %v2648_v24 = vpop.xlane.xlu1 %2647 }
0x13be   :  { %v2650_v25 = vmul.f32 0.03125, %v2648_v24  ;;  %v2645_v26 = vpop.xlane.xlu0 %2644 }
0x13bf   :  { %v2649_v27 = vmul.f32 0.03125, %v2645_v26 }
0x13c0   :  { %v2652_v28 = vsub.f32 %v2642_v11, %v2650_v25 }
0x13c1   :  { %v2651_v32 = vsub.f32 %v2641_v16, %v2649_v27 }
0x13c2   :  { %v2654_v33 = vmul.f32 %v2652_v28, %v2652_v28 }
0x13c3   :  { %v2653_v34 = vmul.f32 %v2651_v32, %v2651_v32 }
0x13c4   :  { %v2658_v35 = vsel %vm199_vm6, %v2654_v33, 0.0 }
0x13c5   :  { %2659 = vadd.xlane.f32.xlu1 %v2658_v35  ;;  %v2655_v6 = vsel %vm199_vm6, %v2653_v34, 0.0 }
0x13c6   :  { %2656 = vadd.xlane.f32.xlu0 %v2655_v6 }
0x13d6   :  { %2702 = vperm.xlu1 %3455, %v2694_v38  }
0x1452   :  { %v2660_v48 = vpop.xlane.xlu1 %2659 }
0x1453   :  { %v2662_v49 = vmul.f32 0.03125, %v2660_v48  ;;  %v2657_v58 = vpop.xlane.xlu0 %2656 }
0x1454   :  { %v2661_v50 = vmul.f32 0.03125, %v2657_v58 }
0x1455   :  { %v2664_v51 = vadd.f32 1e-05, %v2662_v49 }
0x1456   :  { %v2663_v52 = vadd.f32 1e-05, %v2661_v50  ;;  %v2703_v45 = vpop.permute.xlu1 %2702 }
0x1457   :  { %3514 = vrsqrt.f32 %v2664_v51  ;;  %v2711_v0 = vmul.f32 %v2898_v31, %v2703_v45 }
0x1458   :  { %3516 = vrsqrt.f32 %v2663_v52 }
0x1461   :  { %v3515_v22 = vpop.eup %3514 }
0x1462   :  { %v3517_v18 = vpop.eup %3516  ;;  %v2668_v1 = vmul.f32 %v3515_v22, %v2652_v28 }
0x1463   :  { %v2667_v43 = vmul.f32 %v3517_v18, %v2651_v32 }
0x1464   :  { %v2674_v59 = vmul.f32 %v2672_v54, %v2668_v1 }
0x1465   :  { %v2673_v60 = vmul.f32 %v2672_v54, %v2667_v43 }
0x1466   :  { %v2680_v36 = vadd.f32 %v2678_v57, %v2674_v59 }
0x1467   :  { %v2679_v61 = vadd.f32 %v2678_v57, %v2673_v60 }
0x1468   :  { %v2714_v62 = vrot.slane %v2680_v36, 7 }
0x146a   :  { %v2716_v63 = vsel %vm2715_vm13, %v2714_v62, %v2679_v61 }
0x146b   :  { %3285 = vmatmul.mubr.msk.f32.vlgmr.msra.gmra.mrb[26].mxu0 %vm199_vm6, %v2716_v63 }
0x153e   :  { %v2785_v2 = vpop.f32.mrb[26].mxu0 }
0x153f   :  { %v2786_v47 = vadd.f32 %v2785_v2, %v2711_v0  ;;  %v3286_v21 = vpop.f32.mrb[27].mxu0 }
0x1541   :  { %v2796_v3 = vadd.f32 %v2900_v4, %v2786_v47 }
0x1543   :  { %2798 = vst.msk [vmem:[#allocation2] sm:$0x3] %vm2797_vm14, %v2796_v3 }
0x1544   :  { %3530 = shalt.err (!%p3527_p4)
}
0x1545   :  { %s3531_s8 = scalar_lea.hbm %s4273_s21, 32 }
0x1546   :  { %p3532_p5 = scmp.ne.s32.totalorder %s4273_s21, %s3531_s8  ;;  %p3535_p6 = scmp.lt.u32.totalorder %s3531_s8, %s4273_s21 }
0x1548   :  { %p3537_p7 = pnand %p3535_p6, %p3532_p5 }
0x154a   :  { %3540 = shalt.err (!%p3537_p7)
}
0x154b   :  { %2808 = dma.vmem_to_hbm [thread:$0]  %s2806_s26, 32, %s4273_s21, [#allocation3]  }
0x154c   :  { %3541 = dma.done.wait [#allocation3], 32  }
0x154d   :  { %3542 = vsyncadd [#allocation3], 4294967264 }
0x154e   :  { %2812 = vsyncpa [#allocation3], 1 }

</bundles_post_ra>
